<compile_context>
chip_gen: v5e
topology: v5e:2x2
jax: 0.10.0
libtpu: 0.0.40
codegen_flags: <defaults>
</compile_context>

<pallas_src>
import functools

import numpy as np
import jax
import jax.numpy as jnp
from jax import lax
from jax.experimental import pallas as pl
from jax.experimental.pallas import tpu as pltpu


# Use the MXU for the 1x1-conv contraction whenever both channel counts are
# at least this large; otherwise fall back to a short VPU broadcast-MAC loop.
_MXU_MIN_CH = 8


# ---------------------------------------------------------------------------
# In-kernel helpers (trace into the Pallas kernel body)
# ---------------------------------------------------------------------------
def _conv1x1(w, x):
    """1x1 conv as a channel contraction: (Cout, Cin) x (Cin, N) -> (Cout, N).

    MXU path (native operand dtype, f32 accumulation) for realistic channel
    counts; VPU broadcast-MAC fallback with two independent accumulator
    chains for the tiny test channels.
    """
    cout, cin = w.shape
    if cin >= _MXU_MIN_CH and cout >= _MXU_MIN_CH:
        return jnp.dot(w, x, preferred_element_type=jnp.float32)

    def mac(c):
        # (Cout,1) * (1,N) -> (Cout,N) via lane + sublane broadcasts (VPU).
        return w[:, c:c + 1].astype(jnp.float32) * x[c:c + 1, :].astype(jnp.float32)

    acc_even = mac(0)
    acc_odd = mac(1) if cin > 1 else None
    for c in range(2, cin, 2):
        acc_even = acc_even + mac(c)
    for c in range(3, cin, 2):
        acc_odd = acc_odd + mac(c)
    return acc_even if acc_odd is None else acc_even + acc_odd


def _bn_silu(y, scale, bias):
    """Folded BatchNorm (per-channel scale/bias, shape (C,1)) + SiLU, in f32."""
    y = y.astype(jnp.float32) * scale + bias
    return y * jax.nn.sigmoid(y)


def _pool_masks(HW, W, HWp):
    """Eight additive {0, -inf} edge masks, each (1, HWp), built from iota.

    masks[0:4]: in-row (W-direction) shifts d = -2,-1,1,2
    masks[4:8]: cross-row (H-direction) shifts d = -2,-1,1,2
    A mask is 0 where the shifted source pixel is inside the valid image and
    -inf otherwise (matches PyTorch's -inf padding for max pooling).
    """
    pix = lax.broadcasted_iota(jnp.int32, (1, HWp), 1)
    col = pix % W
    zero = jnp.zeros((1, HWp), jnp.float32)
    ninf = jnp.full((1, HWp), -jnp.inf, jnp.float32)
    masks = []
    for d in (-2, -1, 1, 2):
        ok = (col + d >= 0) & (col + d < W)
        masks.append(jnp.where(ok, zero, ninf))
    for d in (-2, -1, 1, 2):
        tgt = pix + d * W
        ok = (tgt >= 0) & (tgt < HW)
        masks.append(jnp.where(ok, zero, ninf))
    return masks


def _maxpool5(x, masks, W):
    """MaxPool2d(k=5, s=1, p=2) on a flattened (C, HWp) image.

    Separable: 5-wide running max along W, then along H.  Shifts are circular
    pltpu.roll's (XLU slot, off the contended VALU); the additive masks kill
    wrapped / out-of-range / padded values.
    """
    n = x.shape[-1]
    xf = x.astype(jnp.float32)
    r = xf
    for i, d in enumerate((-2, -1, 1, 2)):
        r = jnp.maximum(r, pltpu.roll(xf, (-d) % n, axis=1) + masks[i])
    out = r
    for i, d in enumerate((-2, -1, 1, 2)):
        out = jnp.maximum(out, pltpu.roll(r, (-d * W) % n, axis=1) + masks[4 + i])
    return out


# ---------------------------------------------------------------------------
# Pallas kernel: one image (C, HWp) per grid step, fully resident in VMEM.
# ---------------------------------------------------------------------------
def _sppf_kernel(x_ref, w1_ref, s1_ref, b1_ref, w2_ref, s2_ref, b2_ref,
                 o_ref, cat_ref, *, W, HW):
    HWp = x_ref.shape[-1]
    Cm = w1_ref.shape[0]

    x = x_ref[0]                                   # (C1, HWp), native dtype

    # Build the 8 pool edge masks once per grid step (iota + compares, VALU).
    masks = _pool_masks(HW, W, HWp)

    # cv1 = 1x1 conv + folded BN + SiLU -> first Cm sublanes of the cat buffer.
    x1 = _bn_silu(_conv1x1(w1_ref[...], x), s1_ref[...], b1_ref[...])
    x1 = x1.astype(cat_ref.dtype)
    cat_ref[0:Cm, :] = x1

    # Three chained 5x5 / stride 1 / pad 2 max pools; each result lands at its
    # sublane offset in the (4*Cm, HWp) cat scratch as it is produced.
    y = x1
    for i in range(1, 4):
        y = _maxpool5(y, masks, W).astype(cat_ref.dtype)
        cat_ref[i * Cm:(i + 1) * Cm, :] = y

    # cv2 over concat([x1, y1, y2, y3]): ONE fused K = 4*Cm contraction.
    out = _bn_silu(_conv1x1(w2_ref[...], cat_ref[...]), s2_ref[...], b2_ref[...])
    o_ref[0] = out.astype(o_ref.dtype)


# ---------------------------------------------------------------------------
# Host-side wrapper
# ---------------------------------------------------------------------------
def sppf_pallas(x, w1_t, s1, b1, w2_t, s2, b2):
    """x: (B, C1, H, W) NCHW (as in the PyTorch module). Returns (B, C2, H, W)."""
    B, C1, H, W = x.shape
    Cm = w1_t.shape[0]
    C2 = w2_t.shape[0]
    HW = H * W
    HWp = ((HW + 127) // 128) * 128               # lane-dense, 128-aligned
    assert w2_t.shape[1] == 4 * Cm

    x_flat = x.reshape(B, C1, HW)                 # pixels -> lanes
    if HWp != HW:
        x_flat = jnp.pad(x_flat, ((0, 0), (0, 0), (0, HWp - HW)))

    s1c, b1c = s1.reshape(Cm, 1), b1.reshape(Cm, 1)
    s2c, b2c = s2.reshape(C2, 1), b2.reshape(C2, 1)

    # Size the scoped VMEM limit from the actual per-step footprint.
    itemsize = x.dtype.itemsize
    vmem_bytes = (
        2 * (C1 + C2) * HWp * itemsize            # double-buffered in/out blocks
        + 4 * Cm * HWp * itemsize                 # cat scratch
        + 8 * Cm * HWp * 4                        # live f32 pool intermediates
        + 8 * HWp * 4                             # masks
        + (Cm * C1 + C2 * 4 * Cm + 2 * (Cm + C2)) * 4  # weights + BN
    )
    vmem_limit = int(min(max(2 * vmem_bytes, 16 * 1024 * 1024),
                         100 * 1024 * 1024))

    out = pl.pallas_call(
        functools.partial(_sppf_kernel, W=W, HW=HW),
        out_shape=jax.ShapeDtypeStruct((B, C2, HWp), x.dtype),
        grid=(B,),
        in_specs=[
            pl.BlockSpec((1, C1, HWp), lambda b: (b, 0, 0)),
            pl.BlockSpec((Cm, C1), lambda b: (0, 0)),
            pl.BlockSpec((Cm, 1), lambda b: (0, 0)),
            pl.BlockSpec((Cm, 1), lambda b: (0, 0)),
            pl.BlockSpec((C2, 4 * Cm), lambda b: (0, 0)),
            pl.BlockSpec((C2, 1), lambda b: (0, 0)),
            pl.BlockSpec((C2, 1), lambda b: (0, 0)),
        ],
        out_specs=pl.BlockSpec((1, C2, HWp), lambda b: (b, 0, 0)),
        scratch_shapes=[pltpu.VMEM((4 * Cm, HWp), x.dtype)],
        compiler_params=pltpu.CompilerParams(
            dimension_semantics=("parallel",),
            vmem_limit_bytes=vmem_limit),
    )(x_flat, w1_t, s1c, b1c, w2_t, s2c, b2c)

    return out[:, :, :HW].reshape(B, C2, H, W)


# ---------------------------------------------------------------------------
# Pure-JAX reference (NCHW) for correctness checking.
# ---------------------------------------------------------------------------
def sppf_ref(x, w1_t, s1, b1, w2_t, s2, b2):
    def conv_bn_silu(z, w_t, s, b):
        y = jnp.einsum("oc,bchw->bohw", w_t, z)
        y = y * s[None, :, None, None] + b[None, :, None, None]
        return y * jax.nn.sigmoid(y)

    def mp(z):
        return lax.reduce_window(
            z, -jnp.inf, lax.max,
            window_dimensions=(1, 1, 5, 5),
            window_strides=(1, 1, 1, 1),
            padding=((0, 0), (0, 0), (2, 2), (2, 2)),
        )

    x1 = conv_bn_silu(x, w1_t, s1, b1)
    y1 = mp(x1)
    y2 = mp(y1)
    y3 = mp(y2)
    cat = jnp.concatenate([x1, y1, y2, y3], axis=1)
    return conv_bn_silu(cat, w2_t, s2, b2)


# ---------------------------------------------------------------------------
# Deterministic parameter construction (BN folded, inference semantics).
# ---------------------------------------------------------------------------
def make_params(key, c1, c2):
    c_ = c1 // 2
    ks = jax.random.split(key, 10)
    eps = 1e-5  # nn.BatchNorm2d default

    def fold_bn(kg, kb, km, kv, c):
        gamma = 1.0 + 0.1 * jax.random.normal(kg, (c,), jnp.float32)
        beta = 0.1 * jax.random.normal(kb, (c,), jnp.float32)
        mean = 0.1 * jax.random.normal(km, (c,), jnp.float32)
        var = jax.random.uniform(kv, (c,), jnp.float32, 0.5, 1.5)
        scale = gamma / jnp.sqrt(var + eps)
        bias = beta - mean * scale
        return scale, bias

    # cv1: Conv2d(c1, c_, 1, 1, bias=False) -> weight (c_, c1) after squeeze.
    w1_t = 0.3 * jax.random.normal(ks[0], (c_, c1), jnp.float32)
    s1, b1 = fold_bn(ks[1], ks[2], ks[3], ks[4], c_)
    # cv2: Conv2d(4*c_, c2, 1, 1, bias=False) -> weight (c2, 4*c_).
    w2_t = 0.3 * jax.random.normal(ks[5], (c2, 4 * c_), jnp.float32)
    s2, b2 = fold_bn(ks[6], ks[7], ks[8], ks[9], c2)
    return w1_t, s1, b1, w2_t, s2, b2


if __name__ == "__main__":
    B, C1, H, W = 2, 4, 16, 16
    C2 = 4

    key = jax.random.PRNGKey(0)
    kx, kp = jax.random.split(key)
    x = jax.random.normal(kx, (B, C1, H, W), jnp.float32)  # NCHW, as in PyTorch
    params = make_params(kp, C1, C2)

    out = jax.block_until_ready(sppf_pallas(x, *params))
    ref = jax.block_until_ready(sppf_ref(x, *params))

    out_np, ref_np = np.asarray(out), np.asarray(ref)
    if not np.allclose(out_np, ref_np, rtol=1e-5, atol=1e-5):
        raise AssertionError(
            "Pallas SPPF mismatch: max abs err = %e"
            % float(np.max(np.abs(out_np - ref_np)))
        )
    print("KERNEL_OK")
</pallas_src>

<mosaic_0001>
module attributes {stable_mosaic.version = 11 : i64} {
  func.func @_sppf_kernel(%arg0: i32, %arg1: memref<1x4x256xf32, #tpu.memory_space<vmem>>, %arg2: memref<2x4xf32, #tpu.memory_space<vmem>>, %arg3: memref<2x1xf32, #tpu.memory_space<vmem>>, %arg4: memref<2x1xf32, #tpu.memory_space<vmem>>, %arg5: memref<4x8xf32, #tpu.memory_space<vmem>>, %arg6: memref<4x1xf32, #tpu.memory_space<vmem>>, %arg7: memref<4x1xf32, #tpu.memory_space<vmem>>, %arg8: memref<1x4x256xf32, #tpu.memory_space<vmem>>, %arg9: memref<8x256xf32, #tpu.memory_space<vmem>>) attributes {dimension_semantics = [#tpu.dimension_semantics<parallel>], iteration_bounds = array<i64: 2>, scalar_prefetch = 0 : i64, scratch_operands = 1 : i64, tpu.core_type = #tpu.core_type<tc>, window_params = [{transform_indices = @transform_0, window_bounds = array<i64: 1, 4, 256>}, {pipeline_mode = #tpu.pipeline_mode<synchronous>, transform_indices = @transform_1, window_bounds = array<i64: 2, 4>}, {pipeline_mode = #tpu.pipeline_mode<synchronous>, transform_indices = @transform_2, window_bounds = array<i64: 2, 1>}, {pipeline_mode = #tpu.pipeline_mode<synchronous>, transform_indices = @transform_3, window_bounds = array<i64: 2, 1>}, {pipeline_mode = #tpu.pipeline_mode<synchronous>, transform_indices = @transform_4, window_bounds = array<i64: 4, 8>}, {pipeline_mode = #tpu.pipeline_mode<synchronous>, transform_indices = @transform_5, window_bounds = array<i64: 4, 1>}, {pipeline_mode = #tpu.pipeline_mode<synchronous>, transform_indices = @transform_6, window_bounds = array<i64: 4, 1>}, {transform_indices = @transform_7, window_bounds = array<i64: 1, 4, 256>}]} {
    %c0 = arith.constant 0 : index
    %c0_0 = arith.constant 0 : index
    %c0_1 = arith.constant 0 : index
    %0 = vector.load %arg1[%c0, %c0_0, %c0_1] : memref<1x4x256xf32, #tpu.memory_space<vmem>>, vector<1x4x256xf32>
    %1 = vector.shape_cast %0 : vector<1x4x256xf32> to vector<4x256xf32>
    %2 = tpu.iota {dimensions = array<i32: 1>} : vector<1x256xi32>
    %c16_i32 = arith.constant 16 : i32
    %c0_i32 = arith.constant 0 : i32
    %3 = arith.cmpi eq, %c16_i32, %c0_i32 : i32
    %c1_i32 = arith.constant 1 : i32
    %4 = arith.select %3, %c1_i32, %c16_i32 : i32
    %5 = vector.broadcast %4 : i32 to vector<1x256xi32>
    %6 = arith.remsi %2, %5 : vector<1x256xi32>
    %c0_i32_2 = arith.constant 0 : i32
    %7 = vector.broadcast %c0_i32_2 : i32 to vector<1x256xi32>
    %8 = arith.cmpi ne, %6, %7 : vector<1x256xi32>
    %c0_i32_3 = arith.constant 0 : i32
    %9 = vector.broadcast %c0_i32_3 : i32 to vector<1x256xi32>
    %10 = arith.cmpi slt, %6, %9 : vector<1x256xi32>
    %c0_i32_4 = arith.constant 0 : i32
    %11 = arith.cmpi slt, %4, %c0_i32_4 : i32
    %12 = vector.broadcast %11 : i1 to vector<1x256xi1>
    %13 = vector.broadcast %12 : vector<1x256xi1> to vector<1x256xi1>
    %14 = arith.xori %10, %13 : vector<1x256xi1>
    %15 = arith.andi %14, %8 : vector<1x256xi1>
    %16 = vector.broadcast %4 : i32 to vector<1x256xi32>
    %17 = arith.addi %6, %16 : vector<1x256xi32>
    %18 = arith.select %15, %17, %6 : vector<1x256xi1>, vector<1x256xi32>
    %cst = arith.constant 0.000000e+00 : f32
    %19 = vector.broadcast %cst : f32 to vector<1x256xf32>
    %cst_5 = arith.constant 0xFF800000 : f32
    %20 = vector.broadcast %cst_5 : f32 to vector<1x256xf32>
    %c-2_i32 = arith.constant -2 : i32
    %21 = vector.broadcast %c-2_i32 : i32 to vector<1x256xi32>
    %22 = arith.addi %18, %21 : vector<1x256xi32>
    %c0_i32_6 = arith.constant 0 : i32
    %23 = vector.broadcast %c0_i32_6 : i32 to vector<1x256xi32>
    %24 = arith.cmpi sge, %22, %23 : vector<1x256xi32>
    %c-2_i32_7 = arith.constant -2 : i32
    %25 = vector.broadcast %c-2_i32_7 : i32 to vector<1x256xi32>
    %26 = arith.addi %18, %25 : vector<1x256xi32>
    %c16_i32_8 = arith.constant 16 : i32
    %27 = vector.broadcast %c16_i32_8 : i32 to vector<1x256xi32>
    %28 = arith.cmpi slt, %26, %27 : vector<1x256xi32>
    %29 = arith.andi %24, %28 : vector<1x256xi1>
    %30 = arith.select %29, %19, %20 : vector<1x256xi1>, vector<1x256xf32>
    %c-1_i32 = arith.constant -1 : i32
    %31 = vector.broadcast %c-1_i32 : i32 to vector<1x256xi32>
    %32 = arith.addi %18, %31 : vector<1x256xi32>
    %c0_i32_9 = arith.constant 0 : i32
    %33 = vector.broadcast %c0_i32_9 : i32 to vector<1x256xi32>
    %34 = arith.cmpi sge, %32, %33 : vector<1x256xi32>
    %c-1_i32_10 = arith.constant -1 : i32
    %35 = vector.broadcast %c-1_i32_10 : i32 to vector<1x256xi32>
    %36 = arith.addi %18, %35 : vector<1x256xi32>
    %c16_i32_11 = arith.constant 16 : i32
    %37 = vector.broadcast %c16_i32_11 : i32 to vector<1x256xi32>
    %38 = arith.cmpi slt, %36, %37 : vector<1x256xi32>
    %39 = arith.andi %34, %38 : vector<1x256xi1>
    %40 = arith.select %39, %19, %20 : vector<1x256xi1>, vector<1x256xf32>
    %c1_i32_12 = arith.constant 1 : i32
    %41 = vector.broadcast %c1_i32_12 : i32 to vector<1x256xi32>
    %42 = arith.addi %18, %41 : vector<1x256xi32>
    %c0_i32_13 = arith.constant 0 : i32
    %43 = vector.broadcast %c0_i32_13 : i32 to vector<1x256xi32>
    %44 = arith.cmpi sge, %42, %43 : vector<1x256xi32>
    %c1_i32_14 = arith.constant 1 : i32
    %45 = vector.broadcast %c1_i32_14 : i32 to vector<1x256xi32>
    %46 = arith.addi %18, %45 : vector<1x256xi32>
    %c16_i32_15 = arith.constant 16 : i32
    %47 = vector.broadcast %c16_i32_15 : i32 to vector<1x256xi32>
    %48 = arith.cmpi slt, %46, %47 : vector<1x256xi32>
    %49 = arith.andi %44, %48 : vector<1x256xi1>
    %50 = arith.select %49, %19, %20 : vector<1x256xi1>, vector<1x256xf32>
    %c2_i32 = arith.constant 2 : i32
    %51 = vector.broadcast %c2_i32 : i32 to vector<1x256xi32>
    %52 = arith.addi %18, %51 : vector<1x256xi32>
    %c0_i32_16 = arith.constant 0 : i32
    %53 = vector.broadcast %c0_i32_16 : i32 to vector<1x256xi32>
    %54 = arith.cmpi sge, %52, %53 : vector<1x256xi32>
    %c2_i32_17 = arith.constant 2 : i32
    %55 = vector.broadcast %c2_i32_17 : i32 to vector<1x256xi32>
    %56 = arith.addi %18, %55 : vector<1x256xi32>
    %c16_i32_18 = arith.constant 16 : i32
    %57 = vector.broadcast %c16_i32_18 : i32 to vector<1x256xi32>
    %58 = arith.cmpi slt, %56, %57 : vector<1x256xi32>
    %59 = arith.andi %54, %58 : vector<1x256xi1>
    %60 = arith.select %59, %19, %20 : vector<1x256xi1>, vector<1x256xf32>
    %c-32_i32 = arith.constant -32 : i32
    %61 = vector.broadcast %c-32_i32 : i32 to vector<1x256xi32>
    %62 = arith.addi %2, %61 : vector<1x256xi32>
    %c0_i32_19 = arith.constant 0 : i32
    %63 = vector.broadcast %c0_i32_19 : i32 to vector<1x256xi32>
    %64 = arith.cmpi sge, %62, %63 : vector<1x256xi32>
    %c256_i32 = arith.constant 256 : i32
    %65 = vector.broadcast %c256_i32 : i32 to vector<1x256xi32>
    %66 = arith.cmpi slt, %62, %65 : vector<1x256xi32>
    %67 = arith.andi %64, %66 : vector<1x256xi1>
    %68 = arith.select %67, %19, %20 : vector<1x256xi1>, vector<1x256xf32>
    %c-16_i32 = arith.constant -16 : i32
    %69 = vector.broadcast %c-16_i32 : i32 to vector<1x256xi32>
    %70 = arith.addi %2, %69 : vector<1x256xi32>
    %c0_i32_20 = arith.constant 0 : i32
    %71 = vector.broadcast %c0_i32_20 : i32 to vector<1x256xi32>
    %72 = arith.cmpi sge, %70, %71 : vector<1x256xi32>
    %c256_i32_21 = arith.constant 256 : i32
    %73 = vector.broadcast %c256_i32_21 : i32 to vector<1x256xi32>
    %74 = arith.cmpi slt, %70, %73 : vector<1x256xi32>
    %75 = arith.andi %72, %74 : vector<1x256xi1>
    %76 = arith.select %75, %19, %20 : vector<1x256xi1>, vector<1x256xf32>
    %c16_i32_22 = arith.constant 16 : i32
    %77 = vector.broadcast %c16_i32_22 : i32 to vector<1x256xi32>
    %78 = arith.addi %2, %77 : vector<1x256xi32>
    %c0_i32_23 = arith.constant 0 : i32
    %79 = vector.broadcast %c0_i32_23 : i32 to vector<1x256xi32>
    %80 = arith.cmpi sge, %78, %79 : vector<1x256xi32>
    %c256_i32_24 = arith.constant 256 : i32
    %81 = vector.broadcast %c256_i32_24 : i32 to vector<1x256xi32>
    %82 = arith.cmpi slt, %78, %81 : vector<1x256xi32>
    %83 = arith.andi %80, %82 : vector<1x256xi1>
    %84 = arith.select %83, %19, %20 : vector<1x256xi1>, vector<1x256xf32>
    %c32_i32 = arith.constant 32 : i32
    %85 = vector.broadcast %c32_i32 : i32 to vector<1x256xi32>
    %86 = arith.addi %2, %85 : vector<1x256xi32>
    %c0_i32_25 = arith.constant 0 : i32
    %87 = vector.broadcast %c0_i32_25 : i32 to vector<1x256xi32>
    %88 = arith.cmpi sge, %86, %87 : vector<1x256xi32>
    %c256_i32_26 = arith.constant 256 : i32
    %89 = vector.broadcast %c256_i32_26 : i32 to vector<1x256xi32>
    %90 = arith.cmpi slt, %86, %89 : vector<1x256xi32>
    %91 = arith.andi %88, %90 : vector<1x256xi1>
    %92 = arith.select %91, %19, %20 : vector<1x256xi1>, vector<1x256xf32>
    %c0_27 = arith.constant 0 : index
    %c0_28 = arith.constant 0 : index
    %93 = vector.load %arg2[%c0_27, %c0_28] : memref<2x4xf32, #tpu.memory_space<vmem>>, vector<2x4xf32>
    %94 = vector.extract_strided_slice %93 {offsets = [0, 0], sizes = [2, 1], strides = [1, 1]} : vector<2x4xf32> to vector<2x1xf32>
    %95 = vector.extract_strided_slice %1 {offsets = [0, 0], sizes = [1, 256], strides = [1, 1]} : vector<4x256xf32> to vector<1x256xf32>
    %96 = vector.broadcast %94 : vector<2x1xf32> to vector<2x256xf32>
    %97 = vector.broadcast %95 : vector<1x256xf32> to vector<2x256xf32>
    %98 = arith.mulf %96, %97 : vector<2x256xf32>
    %99 = vector.extract_strided_slice %93 {offsets = [0, 1], sizes = [2, 1], strides = [1, 1]} : vector<2x4xf32> to vector<2x1xf32>
    %100 = vector.extract_strided_slice %1 {offsets = [1, 0], sizes = [1, 256], strides = [1, 1]} : vector<4x256xf32> to vector<1x256xf32>
    %101 = vector.broadcast %99 : vector<2x1xf32> to vector<2x256xf32>
    %102 = vector.broadcast %100 : vector<1x256xf32> to vector<2x256xf32>
    %103 = arith.mulf %101, %102 : vector<2x256xf32>
    %104 = vector.extract_strided_slice %93 {offsets = [0, 2], sizes = [2, 1], strides = [1, 1]} : vector<2x4xf32> to vector<2x1xf32>
    %105 = vector.extract_strided_slice %1 {offsets = [2, 0], sizes = [1, 256], strides = [1, 1]} : vector<4x256xf32> to vector<1x256xf32>
    %106 = vector.broadcast %104 : vector<2x1xf32> to vector<2x256xf32>
    %107 = vector.broadcast %105 : vector<1x256xf32> to vector<2x256xf32>
    %108 = arith.mulf %106, %107 : vector<2x256xf32>
    %109 = arith.addf %98, %108 : vector<2x256xf32>
    %110 = vector.extract_strided_slice %93 {offsets = [0, 3], sizes = [2, 1], strides = [1, 1]} : vector<2x4xf32> to vector<2x1xf32>
    %111 = vector.extract_strided_slice %1 {offsets = [3, 0], sizes = [1, 256], strides = [1, 1]} : vector<4x256xf32> to vector<1x256xf32>
    %112 = vector.broadcast %110 : vector<2x1xf32> to vector<2x256xf32>
    %113 = vector.broadcast %111 : vector<1x256xf32> to vector<2x256xf32>
    %114 = arith.mulf %112, %113 : vector<2x256xf32>
    %115 = arith.addf %103, %114 : vector<2x256xf32>
    %116 = arith.addf %109, %115 : vector<2x256xf32>
    %c0_29 = arith.constant 0 : index
    %c0_30 = arith.constant 0 : index
    %117 = vector.load %arg3[%c0_29, %c0_30] : memref<2x1xf32, #tpu.memory_space<vmem>>, vector<2x1xf32>
    %c0_31 = arith.constant 0 : index
    %c0_32 = arith.constant 0 : index
    %118 = vector.load %arg4[%c0_31, %c0_32] : memref<2x1xf32, #tpu.memory_space<vmem>>, vector<2x1xf32>
    %119 = vector.broadcast %117 : vector<2x1xf32> to vector<2x256xf32>
    %120 = arith.mulf %116, %119 : vector<2x256xf32>
    %121 = vector.broadcast %118 : vector<2x1xf32> to vector<2x256xf32>
    %122 = arith.addf %120, %121 : vector<2x256xf32>
    %123 = arith.negf %122 : vector<2x256xf32>
    %124 = math.exp %123 : vector<2x256xf32>
    %cst_33 = arith.constant 1.000000e+00 : f32
    %125 = vector.broadcast %cst_33 : f32 to vector<2x256xf32>
    %126 = arith.addf %125, %124 : vector<2x256xf32>
    %127 = arith.divf %125, %126 : vector<2x256xf32>
    %128 = arith.mulf %122, %127 : vector<2x256xf32>
    %c0_34 = arith.constant 0 : index
    %c0_35 = arith.constant 0 : index
    %129 = vector.load %arg9[%c0_34, %c0_35] : memref<8x256xf32, #tpu.memory_space<vmem>>, vector<2x256xf32>
    tpu.vector_store %arg9[%c0_34, %c0_35], %128 {strides = array<i32>} : memref<8x256xf32, #tpu.memory_space<vmem>>, vector<2x256xf32>,
    %c2_i32_36 = arith.constant 2 : i32
    %130 = tpu.dynamic_rotate %128 by %c2_i32_36 dim 1 : vector<2x256xf32>, i32 -> vector<2x256xf32>
    %131 = vector.broadcast %30 : vector<1x256xf32> to vector<2x256xf32>
    %132 = arith.addf %130, %131 : vector<2x256xf32>
    %133 = arith.maximumf %128, %132 : vector<2x256xf32>
    %c1_i32_37 = arith.constant 1 : i32
    %134 = tpu.dynamic_rotate %128 by %c1_i32_37 dim 1 : vector<2x256xf32>, i32 -> vector<2x256xf32>
    %135 = vector.broadcast %40 : vector<1x256xf32> to vector<2x256xf32>
    %136 = arith.addf %134, %135 : vector<2x256xf32>
    %137 = arith.maximumf %133, %136 : vector<2x256xf32>
    %c255_i32 = arith.constant 255 : i32
    %138 = tpu.dynamic_rotate %128 by %c255_i32 dim 1 : vector<2x256xf32>, i32 -> vector<2x256xf32>
    %139 = vector.broadcast %50 : vector<1x256xf32> to vector<2x256xf32>
    %140 = arith.addf %138, %139 : vector<2x256xf32>
    %141 = arith.maximumf %137, %140 : vector<2x256xf32>
    %c254_i32 = arith.constant 254 : i32
    %142 = tpu.dynamic_rotate %128 by %c254_i32 dim 1 : vector<2x256xf32>, i32 -> vector<2x256xf32>
    %143 = vector.broadcast %60 : vector<1x256xf32> to vector<2x256xf32>
    %144 = arith.addf %142, %143 : vector<2x256xf32>
    %145 = arith.maximumf %141, %144 : vector<2x256xf32>
    %c32_i32_38 = arith.constant 32 : i32
    %146 = tpu.dynamic_rotate %145 by %c32_i32_38 dim 1 : vector<2x256xf32>, i32 -> vector<2x256xf32>
    %147 = vector.broadcast %68 : vector<1x256xf32> to vector<2x256xf32>
    %148 = arith.addf %146, %147 : vector<2x256xf32>
    %149 = arith.maximumf %145, %148 : vector<2x256xf32>
    %c16_i32_39 = arith.constant 16 : i32
    %150 = tpu.dynamic_rotate %145 by %c16_i32_39 dim 1 : vector<2x256xf32>, i32 -> vector<2x256xf32>
    %151 = vector.broadcast %76 : vector<1x256xf32> to vector<2x256xf32>
    %152 = arith.addf %150, %151 : vector<2x256xf32>
    %153 = arith.maximumf %149, %152 : vector<2x256xf32>
    %c240_i32 = arith.constant 240 : i32
    %154 = tpu.dynamic_rotate %145 by %c240_i32 dim 1 : vector<2x256xf32>, i32 -> vector<2x256xf32>
    %155 = vector.broadcast %84 : vector<1x256xf32> to vector<2x256xf32>
    %156 = arith.addf %154, %155 : vector<2x256xf32>
    %157 = arith.maximumf %153, %156 : vector<2x256xf32>
    %c224_i32 = arith.constant 224 : i32
    %158 = tpu.dynamic_rotate %145 by %c224_i32 dim 1 : vector<2x256xf32>, i32 -> vector<2x256xf32>
    %159 = vector.broadcast %92 : vector<1x256xf32> to vector<2x256xf32>
    %160 = arith.addf %158, %159 : vector<2x256xf32>
    %161 = arith.maximumf %157, %160 : vector<2x256xf32>
    %c2 = arith.constant 2 : index
    %c0_40 = arith.constant 0 : index
    %162 = vector.load %arg9[%c2, %c0_40] : memref<8x256xf32, #tpu.memory_space<vmem>>, vector<2x256xf32>
    tpu.vector_store %arg9[%c2, %c0_40], %161 {strides = array<i32>} : memref<8x256xf32, #tpu.memory_space<vmem>>, vector<2x256xf32>,
    %c2_i32_41 = arith.constant 2 : i32
    %163 = tpu.dynamic_rotate %161 by %c2_i32_41 dim 1 : vector<2x256xf32>, i32 -> vector<2x256xf32>
    %164 = vector.broadcast %30 : vector<1x256xf32> to vector<2x256xf32>
    %165 = arith.addf %163, %164 : vector<2x256xf32>
    %166 = arith.maximumf %161, %165 : vector<2x256xf32>
    %c1_i32_42 = arith.constant 1 : i32
    %167 = tpu.dynamic_rotate %161 by %c1_i32_42 dim 1 : vector<2x256xf32>, i32 -> vector<2x256xf32>
    %168 = vector.broadcast %40 : vector<1x256xf32> to vector<2x256xf32>
    %169 = arith.addf %167, %168 : vector<2x256xf32>
    %170 = arith.maximumf %166, %169 : vector<2x256xf32>
    %c255_i32_43 = arith.constant 255 : i32
    %171 = tpu.dynamic_rotate %161 by %c255_i32_43 dim 1 : vector<2x256xf32>, i32 -> vector<2x256xf32>
    %172 = vector.broadcast %50 : vector<1x256xf32> to vector<2x256xf32>
    %173 = arith.addf %171, %172 : vector<2x256xf32>
    %174 = arith.maximumf %170, %173 : vector<2x256xf32>
    %c254_i32_44 = arith.constant 254 : i32
    %175 = tpu.dynamic_rotate %161 by %c254_i32_44 dim 1 : vector<2x256xf32>, i32 -> vector<2x256xf32>
    %176 = vector.broadcast %60 : vector<1x256xf32> to vector<2x256xf32>
    %177 = arith.addf %175, %176 : vector<2x256xf32>
    %178 = arith.maximumf %174, %177 : vector<2x256xf32>
    %c32_i32_45 = arith.constant 32 : i32
    %179 = tpu.dynamic_rotate %178 by %c32_i32_45 dim 1 : vector<2x256xf32>, i32 -> vector<2x256xf32>
    %180 = vector.broadcast %68 : vector<1x256xf32> to vector<2x256xf32>
    %181 = arith.addf %179, %180 : vector<2x256xf32>
    %182 = arith.maximumf %178, %181 : vector<2x256xf32>
    %c16_i32_46 = arith.constant 16 : i32
    %183 = tpu.dynamic_rotate %178 by %c16_i32_46 dim 1 : vector<2x256xf32>, i32 -> vector<2x256xf32>
    %184 = vector.broadcast %76 : vector<1x256xf32> to vector<2x256xf32>
    %185 = arith.addf %183, %184 : vector<2x256xf32>
    %186 = arith.maximumf %182, %185 : vector<2x256xf32>
    %c240_i32_47 = arith.constant 240 : i32
    %187 = tpu.dynamic_rotate %178 by %c240_i32_47 dim 1 : vector<2x256xf32>, i32 -> vector<2x256xf32>
    %188 = vector.broadcast %84 : vector<1x256xf32> to vector<2x256xf32>
    %189 = arith.addf %187, %188 : vector<2x256xf32>
    %190 = arith.maximumf %186, %189 : vector<2x256xf32>
    %c224_i32_48 = arith.constant 224 : i32
    %191 = tpu.dynamic_rotate %178 by %c224_i32_48 dim 1 : vector<2x256xf32>, i32 -> vector<2x256xf32>
    %192 = vector.broadcast %92 : vector<1x256xf32> to vector<2x256xf32>
    %193 = arith.addf %191, %192 : vector<2x256xf32>
    %194 = arith.maximumf %190, %193 : vector<2x256xf32>
    %c4 = arith.constant 4 : index
    %c0_49 = arith.constant 0 : index
    %195 = vector.load %arg9[%c4, %c0_49] : memref<8x256xf32, #tpu.memory_space<vmem>>, vector<2x256xf32>
    tpu.vector_store %arg9[%c4, %c0_49], %194 {strides = array<i32>} : memref<8x256xf32, #tpu.memory_space<vmem>>, vector<2x256xf32>,
    %c2_i32_50 = arith.constant 2 : i32
    %196 = tpu.dynamic_rotate %194 by %c2_i32_50 dim 1 : vector<2x256xf32>, i32 -> vector<2x256xf32>
    %197 = vector.broadcast %30 : vector<1x256xf32> to vector<2x256xf32>
    %198 = arith.addf %196, %197 : vector<2x256xf32>
    %199 = arith.maximumf %194, %198 : vector<2x256xf32>
    %c1_i32_51 = arith.constant 1 : i32
    %200 = tpu.dynamic_rotate %194 by %c1_i32_51 dim 1 : vector<2x256xf32>, i32 -> vector<2x256xf32>
    %201 = vector.broadcast %40 : vector<1x256xf32> to vector<2x256xf32>
    %202 = arith.addf %200, %201 : vector<2x256xf32>
    %203 = arith.maximumf %199, %202 : vector<2x256xf32>
    %c255_i32_52 = arith.constant 255 : i32
    %204 = tpu.dynamic_rotate %194 by %c255_i32_52 dim 1 : vector<2x256xf32>, i32 -> vector<2x256xf32>
    %205 = vector.broadcast %50 : vector<1x256xf32> to vector<2x256xf32>
    %206 = arith.addf %204, %205 : vector<2x256xf32>
    %207 = arith.maximumf %203, %206 : vector<2x256xf32>
    %c254_i32_53 = arith.constant 254 : i32
    %208 = tpu.dynamic_rotate %194 by %c254_i32_53 dim 1 : vector<2x256xf32>, i32 -> vector<2x256xf32>
    %209 = vector.broadcast %60 : vector<1x256xf32> to vector<2x256xf32>
    %210 = arith.addf %208, %209 : vector<2x256xf32>
    %211 = arith.maximumf %207, %210 : vector<2x256xf32>
    %c32_i32_54 = arith.constant 32 : i32
    %212 = tpu.dynamic_rotate %211 by %c32_i32_54 dim 1 : vector<2x256xf32>, i32 -> vector<2x256xf32>
    %213 = vector.broadcast %68 : vector<1x256xf32> to vector<2x256xf32>
    %214 = arith.addf %212, %213 : vector<2x256xf32>
    %215 = arith.maximumf %211, %214 : vector<2x256xf32>
    %c16_i32_55 = arith.constant 16 : i32
    %216 = tpu.dynamic_rotate %211 by %c16_i32_55 dim 1 : vector<2x256xf32>, i32 -> vector<2x256xf32>
    %217 = vector.broadcast %76 : vector<1x256xf32> to vector<2x256xf32>
    %218 = arith.addf %216, %217 : vector<2x256xf32>
    %219 = arith.maximumf %215, %218 : vector<2x256xf32>
    %c240_i32_56 = arith.constant 240 : i32
    %220 = tpu.dynamic_rotate %211 by %c240_i32_56 dim 1 : vector<2x256xf32>, i32 -> vector<2x256xf32>
    %221 = vector.broadcast %84 : vector<1x256xf32> to vector<2x256xf32>
    %222 = arith.addf %220, %221 : vector<2x256xf32>
    %223 = arith.maximumf %219, %222 : vector<2x256xf32>
    %c224_i32_57 = arith.constant 224 : i32
    %224 = tpu.dynamic_rotate %211 by %c224_i32_57 dim 1 : vector<2x256xf32>, i32 -> vector<2x256xf32>
    %225 = vector.broadcast %92 : vector<1x256xf32> to vector<2x256xf32>
    %226 = arith.addf %224, %225 : vector<2x256xf32>
    %227 = arith.maximumf %223, %226 : vector<2x256xf32>
    %c6 = arith.constant 6 : index
    %c0_58 = arith.constant 0 : index
    %228 = vector.load %arg9[%c6, %c0_58] : memref<8x256xf32, #tpu.memory_space<vmem>>, vector<2x256xf32>
    tpu.vector_store %arg9[%c6, %c0_58], %227 {strides = array<i32>} : memref<8x256xf32, #tpu.memory_space<vmem>>, vector<2x256xf32>,
    %c0_59 = arith.constant 0 : index
    %c0_60 = arith.constant 0 : index
    %229 = vector.load %arg5[%c0_59, %c0_60] : memref<4x8xf32, #tpu.memory_space<vmem>>, vector<4x8xf32>
    %c0_61 = arith.constant 0 : index
    %c0_62 = arith.constant 0 : index
    %230 = vector.load %arg9[%c0_61, %c0_62] : memref<8x256xf32, #tpu.memory_space<vmem>>, vector<8x256xf32>
    %231 = vector.extract_strided_slice %229 {offsets = [0, 0], sizes = [4, 1], strides = [1, 1]} : vector<4x8xf32> to vector<4x1xf32>
    %232 = vector.extract_strided_slice %230 {offsets = [0, 0], sizes = [1, 256], strides = [1, 1]} : vector<8x256xf32> to vector<1x256xf32>
    %233 = vector.broadcast %231 : vector<4x1xf32> to vector<4x256xf32>
    %234 = vector.broadcast %232 : vector<1x256xf32> to vector<4x256xf32>
    %235 = arith.mulf %233, %234 : vector<4x256xf32>
    %236 = vector.extract_strided_slice %229 {offsets = [0, 1], sizes = [4, 1], strides = [1, 1]} : vector<4x8xf32> to vector<4x1xf32>
    %237 = vector.extract_strided_slice %230 {offsets = [1, 0], sizes = [1, 256], strides = [1, 1]} : vector<8x256xf32> to vector<1x256xf32>
    %238 = vector.broadcast %236 : vector<4x1xf32> to vector<4x256xf32>
    %239 = vector.broadcast %237 : vector<1x256xf32> to vector<4x256xf32>
    %240 = arith.mulf %238, %239 : vector<4x256xf32>
    %241 = vector.extract_strided_slice %229 {offsets = [0, 2], sizes = [4, 1], strides = [1, 1]} : vector<4x8xf32> to vector<4x1xf32>
    %242 = vector.extract_strided_slice %230 {offsets = [2, 0], sizes = [1, 256], strides = [1, 1]} : vector<8x256xf32> to vector<1x256xf32>
    %243 = vector.broadcast %241 : vector<4x1xf32> to vector<4x256xf32>
    %244 = vector.broadcast %242 : vector<1x256xf32> to vector<4x256xf32>
    %245 = arith.mulf %243, %244 : vector<4x256xf32>
    %246 = arith.addf %235, %245 : vector<4x256xf32>
    %247 = vector.extract_strided_slice %229 {offsets = [0, 4], sizes = [4, 1], strides = [1, 1]} : vector<4x8xf32> to vector<4x1xf32>
    %248 = vector.extract_strided_slice %230 {offsets = [4, 0], sizes = [1, 256], strides = [1, 1]} : vector<8x256xf32> to vector<1x256xf32>
    %249 = vector.broadcast %247 : vector<4x1xf32> to vector<4x256xf32>
    %250 = vector.broadcast %248 : vector<1x256xf32> to vector<4x256xf32>
    %251 = arith.mulf %249, %250 : vector<4x256xf32>
    %252 = arith.addf %246, %251 : vector<4x256xf32>
    %253 = vector.extract_strided_slice %229 {offsets = [0, 6], sizes = [4, 1], strides = [1, 1]} : vector<4x8xf32> to vector<4x1xf32>
    %254 = vector.extract_strided_slice %230 {offsets = [6, 0], sizes = [1, 256], strides = [1, 1]} : vector<8x256xf32> to vector<1x256xf32>
    %255 = vector.broadcast %253 : vector<4x1xf32> to vector<4x256xf32>
    %256 = vector.broadcast %254 : vector<1x256xf32> to vector<4x256xf32>
    %257 = arith.mulf %255, %256 : vector<4x256xf32>
    %258 = arith.addf %252, %257 : vector<4x256xf32>
    %259 = vector.extract_strided_slice %229 {offsets = [0, 3], sizes = [4, 1], strides = [1, 1]} : vector<4x8xf32> to vector<4x1xf32>
    %260 = vector.extract_strided_slice %230 {offsets = [3, 0], sizes = [1, 256], strides = [1, 1]} : vector<8x256xf32> to vector<1x256xf32>
    %261 = vector.broadcast %259 : vector<4x1xf32> to vector<4x256xf32>
    %262 = vector.broadcast %260 : vector<1x256xf32> to vector<4x256xf32>
    %263 = arith.mulf %261, %262 : vector<4x256xf32>
    %264 = arith.addf %240, %263 : vector<4x256xf32>
    %265 = vector.extract_strided_slice %229 {offsets = [0, 5], sizes = [4, 1], strides = [1, 1]} : vector<4x8xf32> to vector<4x1xf32>
    %266 = vector.extract_strided_slice %230 {offsets = [5, 0], sizes = [1, 256], strides = [1, 1]} : vector<8x256xf32> to vector<1x256xf32>
    %267 = vector.broadcast %265 : vector<4x1xf32> to vector<4x256xf32>
    %268 = vector.broadcast %266 : vector<1x256xf32> to vector<4x256xf32>
    %269 = arith.mulf %267, %268 : vector<4x256xf32>
    %270 = arith.addf %264, %269 : vector<4x256xf32>
    %271 = vector.extract_strided_slice %229 {offsets = [0, 7], sizes = [4, 1], strides = [1, 1]} : vector<4x8xf32> to vector<4x1xf32>
    %272 = vector.extract_strided_slice %230 {offsets = [7, 0], sizes = [1, 256], strides = [1, 1]} : vector<8x256xf32> to vector<1x256xf32>
    %273 = vector.broadcast %271 : vector<4x1xf32> to vector<4x256xf32>
    %274 = vector.broadcast %272 : vector<1x256xf32> to vector<4x256xf32>
    %275 = arith.mulf %273, %274 : vector<4x256xf32>
    %276 = arith.addf %270, %275 : vector<4x256xf32>
    %277 = arith.addf %258, %276 : vector<4x256xf32>
    %c0_63 = arith.constant 0 : index
    %c0_64 = arith.constant 0 : index
    %278 = vector.load %arg6[%c0_63, %c0_64] : memref<4x1xf32, #tpu.memory_space<vmem>>, vector<4x1xf32>
    %c0_65 = arith.constant 0 : index
    %c0_66 = arith.constant 0 : index
    %279 = vector.load %arg7[%c0_65, %c0_66] : memref<4x1xf32, #tpu.memory_space<vmem>>, vector<4x1xf32>
    %280 = vector.broadcast %278 : vector<4x1xf32> to vector<4x256xf32>
    %281 = arith.mulf %277, %280 : vector<4x256xf32>
    %282 = vector.broadcast %279 : vector<4x1xf32> to vector<4x256xf32>
    %283 = arith.addf %281, %282 : vector<4x256xf32>
    %284 = arith.negf %283 : vector<4x256xf32>
    %285 = math.exp %284 : vector<4x256xf32>
    %cst_67 = arith.constant 1.000000e+00 : f32
    %286 = vector.broadcast %cst_67 : f32 to vector<4x256xf32>
    %287 = arith.addf %286, %285 : vector<4x256xf32>
    %288 = arith.divf %286, %287 : vector<4x256xf32>
    %289 = arith.mulf %283, %288 : vector<4x256xf32>
    %c0_68 = arith.constant 0 : index
    %c0_69 = arith.constant 0 : index
    %c0_70 = arith.constant 0 : index
    %290 = vector.load %arg8[%c0_68, %c0_69, %c0_70] : memref<1x4x256xf32, #tpu.memory_space<vmem>>, vector<1x4x256xf32>
    %291 = vector.shape_cast %290 : vector<1x4x256xf32> to vector<4x256xf32>
    %292 = vector.shape_cast %289 : vector<4x256xf32> to vector<1x4x256xf32>
    tpu.vector_store %arg8[%c0_68, %c0_69, %c0_70], %292 {strides = array<i32>} : memref<1x4x256xf32, #tpu.memory_space<vmem>>, vector<1x4x256xf32>,
    return
  }
  func.func @transform_0(%arg0: i32) -> (i32, i32, i32) {
    %c0_i32 = arith.constant 0 : i32
    %c0_i32_0 = arith.constant 0 : i32
    %c0_i32_1 = arith.constant 0 : i32
    return %arg0, %c0_i32, %c0_i32_0 : i32, i32, i32
  }
  func.func @transform_1(%arg0: i32) -> (i32, i32) {
    %c0_i32 = arith.constant 0 : i32
    %c0_i32_0 = arith.constant 0 : i32
    %c0_i32_1 = arith.constant 0 : i32
    return %c0_i32, %c0_i32_0 : i32, i32
  }
  func.func @transform_2(%arg0: i32) -> (i32, i32) {
    %c0_i32 = arith.constant 0 : i32
    %c0_i32_0 = arith.constant 0 : i32
    %c0_i32_1 = arith.constant 0 : i32
    return %c0_i32, %c0_i32_0 : i32, i32
  }
  func.func @transform_3(%arg0: i32) -> (i32, i32) {
    %c0_i32 = arith.constant 0 : i32
    %c0_i32_0 = arith.constant 0 : i32
    %c0_i32_1 = arith.constant 0 : i32
    return %c0_i32, %c0_i32_0 : i32, i32
  }
  func.func @transform_4(%arg0: i32) -> (i32, i32) {
    %c0_i32 = arith.constant 0 : i32
    %c0_i32_0 = arith.constant 0 : i32
    %c0_i32_1 = arith.constant 0 : i32
    return %c0_i32, %c0_i32_0 : i32, i32
  }
  func.func @transform_5(%arg0: i32) -> (i32, i32) {
    %c0_i32 = arith.constant 0 : i32
    %c0_i32_0 = arith.constant 0 : i32
    %c0_i32_1 = arith.constant 0 : i32
    return %c0_i32, %c0_i32_0 : i32, i32
  }
  func.func @transform_6(%arg0: i32) -> (i32, i32) {
    %c0_i32 = arith.constant 0 : i32
    %c0_i32_0 = arith.constant 0 : i32
    %c0_i32_1 = arith.constant 0 : i32
    return %c0_i32, %c0_i32_0 : i32, i32
  }
  func.func @transform_7(%arg0: i32) -> (i32, i32, i32) {
    %c0_i32 = arith.constant 0 : i32
    %c0_i32_0 = arith.constant 0 : i32
    %c0_i32_1 = arith.constant 0 : i32
    return %arg0, %c0_i32, %c0_i32_0 : i32, i32, i32
  }
}

</mosaic_0001>

<bundles_post_ra>
// kernel: tpu_custom_call.1
= control target key start
LH: loop header
LB: loop body
LE: loop exit
PB: predicated region body
PF: predicated region fallthrough
CT: control target
= control target key end

     0   :  { %12 = vsyncpa [#allocation4], 0  ;;  %s1702_s0 = inlined_call_operand.hbm [shape: f32[2,4,256], index: 0, kind: input, shape index: {}]   ;;  %s1703_s1 = inlined_call_operand.vmem [shape: f32[2,4], index: 1, kind: input, shape index: {}]   ;;  %s1704_s2 = inlined_call_operand.vmem [shape: f32[2,1], index: 2, kind: input, shape index: {}]   ;;  %s1705_s3 = inlined_call_operand.vmem [shape: f32[2,1], index: 3, kind: input, shape index: {}]   ;;  %s1706_s4 = inlined_call_operand.vmem [shape: f32[4,8], index: 4, kind: input, shape index: {}]   ;;  %s1707_s5 = inlined_call_operand.vmem [shape: f32[4,1], index: 5, kind: input, shape index: {}]   ;;  %s1708_s6 = inlined_call_operand.vmem [shape: f32[4,1], index: 6, kind: input, shape index: {}]   ;;  %s1709_s7 = inlined_call_operand.hbm [shape: f32[2,4,256], index: 7, kind: output, shape index: {}]  }
   0x1   :  { %14 = vsyncpa [#allocation4 + $0x1], 0 }
   0x2   :  { %15 = vsyncpa [#allocation5], 0 }
   0x3   :  { %17 = vsyncpa [#allocation5 + $0x1], 0  ;;  %s1294_s24 = smov 0   ;;  %s1296_s25 = smov 0  }
   0x4   :  { %s1298_s26 = smov 0   ;;  %s1300_s27 = smov 0  }
   0x5 LB: > { %s1315_s28 = sadd.s32 4294967295, %s1235_s27   ;;  %s1024_s29 = sadd.s32 4294967294, %s1235_s27   ;;  %s1235_s27 = sphi %s1300_s27, %s1721_s27   ;;  %s1231_s26 = sphi %s1298_s26, %s1720_s26   ;;  %s1227_s25 = sphi %s1296_s25, %s1719_s25   ;;  %s1223_s24 = sphi %s1294_s24, %s1718_s24  }
   0x6   : > { %s1319_s30 = sadd.s32 1, %s1235_s27   ;;  %s30_s8 = sadd.s32 1, %s1231_s26 }
   0x7   : > { %s27_s9 = ssub.s32 %s1235_s27, %s1319_s30  ;;  %p37_p0 = scmp.ne.s32.totalorder %s1231_s26, %s1227_s25 }
   0x8   : > { %p28_p1 = scmp.eq.s32.totalorder %s27_s9, 0  ;;  %p38_p2 = scmp.eq.s32.totalorder %s1235_s27, 0 }
   0x9   : > { %p43_p3 = scmp.ne.s32.totalorder %s1227_s25, %s1223_s24  ;;  %p44_p4 = scmp.eq.s32.totalorder %s1315_s28, 0 }
   0xa   : > { %s1331_s10 = scalar_select %p28_p1, %s1231_s26, %s30_s8  }
   0xb   : > { %p1333_p5 = por %p38_p2, %p37_p0  ;;  %p1337_p6 = por %p44_p4, %p43_p3 }
   0xc   : > { %1710 = sst [smem:[#allocation9_spill]] %s1331_s10  ;;  %p193_p7 = scmp.eq.s32.totalorder %s1315_s28, 1 }
   0xd   : > { %p199_p8 = scmp.eq.s32.totalorder %s1024_s29, 1  ;;  %p1056_p10 = scmp.lt.s32.totalorder %s1235_s27, 2 }
   0xe   : > { %p1344_p11 = por %p193_p7, %p37_p0  ;;  %s237_s15 = sand.u32 1, %s1231_s26  }
   0xf   : > { %p1348_p12 = por %p199_p8, %p43_p3  ;;  %s1042_s16 = sshll.u32 %s1235_s27, 3 }
  0x10   : > { %s1027_s17 = sshll.u32 %s237_s15, 3  ;;  %s246_s20 = scalar_lea.hbm %s1702_s0, %s1042_s16 }
  0x11   : > { %s248_s21 = sshll.u32 %s246_s20, 4  ;;  %s241_s22 = scalar_lea.vmem [#allocation3], %s1027_s17  ;;  %s249_s21 = int_to_ptr.hbm [resolvable:$true] %s248_s21 }
  0x12   : > { %s250_s23 = sshll.u32 %s241_s22, 4  ;;  %p1359_p13 = pnand %p1056_p10, %p1333_p5  ;;  %s251_s23 = int_to_ptr.vmem [resolvable:$true] %s250_s23 }
  0x13   : > { %p1030_p0 = scmp.ge.s32.totalorder %s1235_s27, 1  ;;  %p255_p1 = scmp.lt.s32.totalorder %s1235_s27, 3 }
  0x14   : > { %s238_s8 = scalar_lea.sflag [#allocation4], %s237_s15  ;;  %s1139_s9 = sshra.s32 %s249_s21, 4  ;;  %s1140_s9 = int_to_ptr.hbm [resolvable:$true] %s1139_s9 }
  0x15   : > { %s1141_s10 = scalar_lea.hbm %s1140_s9, 8  ;;  %p1143_p3 = pneg %p1359_p13 }
  0x16   : > { %p1142_p2 = scmp.ne.s32.totalorder %s1140_s9, %s1141_s10  ;;  %s1146_s11 = scalar_lea.hbm %s1702_s0, 16 }
  0x17   : > { %p1147_p5 = scmp.lt.s32.totalorder %s1140_s9, %s1702_s0  ;;  %p1148_p8 = scmp.lt.s32.totalorder %s1146_s11, %s1141_s10 }
  0x18   : > { %p1144_p4 = pnand %p1143_p3, %p1142_p2 }
  0x19   : > { %p1149_p10 = por %p1148_p8, %p1147_p5 }
  0x1a   : > { %p1145_p7 = pneg %p1144_p4 }
  0x1c   : > { %p1150_p9 = pnand %p1149_p10, %p1145_p7 }
  0x1e   : > { %1153 = shalt.err (!%p1150_p9)
}
  0x1f   : > { %1051 = dma.hbm_to_vmem [thread:$0]  (!%p1359_p13), %s249_s21, 128, %s251_s23, %s238_s8  }
  0x20   : > { %p256_p2 = pnand %p1030_p0, %p255_p1 }
  0x21   : > { %s1380_s15 = sand.u32 (!%p256_p2), 1, %s1227_s25  }
  0x22   : > { %259 = sbr.rel (%p256_p2) target bundleno = 1090 (0x442), region = 48  ;;  %s1031_s10 = sshll.u32 (!%p256_p2), %s1380_s15, 3 }
  0x23   : > { %s262_s20 = scalar_lea.sflag (!%p256_p2), [#allocation4], %s1380_s15  ;;  %s265_s22 = scalar_lea.vmem (!%p256_p2), [#allocation3], %s1031_s10 }
  0x27   : > { %1214 = dma.done.wait (%p1337_p6), %s262_s20, 128  }
  0x28   : > { %1216 = vsyncadd (%p1337_p6), %s262_s20, 4294967168  ;;  %v1237_v0 = vmov 2   ;;  %v1238_v1 = vmov 0   ;;  %v405_v2 = vld [vmem:[%s1703_s1] sm:$0x3]  ;;  %v1239_v5 = vmov 3  }
  0x29   : > { %1109 = vset.pattern.permute.xlu1 %v1237_v0  ;;  %1107 = vset.pattern.permute.xlu0 %v1238_v1  ;;  %v462_v3 = vld [vmem:[%s1704_s2] sm:$0x3]  ;;  %v1240_v6 = vmov 1   ;;  %v297_v7 = vld [vmem:[%s265_s22] sm:$0xff]  ;;  %s1241_s16 = smov 1   ;;  %s1242_s17 = smov 2  }
  0x2a   : > { %1111 = vset.pattern.permute.xlu2 %v1238_v1  ;;  %433 = vperm.xlu1 %1109, %v405_v2   ;;  %v463_v4 = vld [vmem:[%s1705_s3] sm:$0x3]  ;;  %v436_v9 = vperm.slane %v297_v7, 2  ;;  %v437_v10 = vperm.slane %v297_v7, 6  ;;  %v412_v12 = vperm.slane %v297_v7, 0  ;;  %v413_v13 = vperm.slane %v297_v7, 4 }
  0x2b   : > { %408 = vperm.xlu0 %1107, %v405_v2   ;;  %466 = vperm.xlu2 %1111, %v462_v3   ;;  %v450_v14 = vperm.slane %v297_v7, 3  ;;  %v451_v15 = vperm.slane %v297_v7, 7  ;;  %v424_v16 = vperm.slane %v297_v7, 1  ;;  %v425_v17 = vperm.slane %v297_v7, 5  ;;  %s1243_s11 = smov 127   ;;  %s1244_s18 = smov 126  }
  0x2c   : > { %v440_v18 = vperm.slane %v436_v9, 2  ;;  %v441_v19 = vperm.slane %v437_v10, 2  ;;  %v416_v20 = vperm.slane %v412_v12, 0  ;;  %v417_v21 = vperm.slane %v413_v13, 0  ;;  %s1246_s19 = smov 32   ;;  %s1247_s20 = smov 16  }
  0x2d   : > { %v454_v22 = vperm.slane %v450_v14, 3  ;;  %v455_v23 = vperm.slane %v451_v15, 3  ;;  %v428_v24 = vperm.slane %v424_v16, 1  ;;  %v429_v25 = vperm.slane %v425_v17, 1  ;;  %s1248_s22 = smov 112   ;;  %s1249_s21 = smov 96  }
  0x2e   : > { %v298_v14 = vlaneseq }
  0x30   : > { %v1425_v15 = vand.u32 127, %v298_v14 }
  0x32   : > { %1110 = vset.pattern.permute.xlu1 %v1239_v5  ;;  %v1428_v16 = vadd.s32 128, %v1425_v15  ;;  %v305_v17 = vand.u32 15, %v1425_v15  ;;  %vm524_vm10 = vcmp.lt.s32.totalorder %v1425_v15, 2  ;;  %vm535_vm13 = vcmp.lt.s32.totalorder %v1425_v15, 1 }
  0x33   : > { %1108 = vset.pattern.permute.xlu0 %v1240_v6  ;;  %447 = vperm.xlu1 %1110, %v405_v2   ;;  %vm546_vm14 = vcmp.lt.s32.totalorder %v1425_v15, 127 }
  0x34   : > { %421 = vperm.xlu0 %1108, %v405_v2   ;;  %473 = vperm.xlu2 %1111, %v463_v4  }
  0x3b   : > { %1112 = vset.pattern.permute.xlu1 %v1238_v1 }
  0x3c   : > { %1114 = vset.pattern.permute.xlu0 %v1237_v0  ;;  %1113 = vset.pattern.permute.xlu2 %v1240_v6 }
  0x85   : > { %v467_v26 = vpop.permute.xlu2 %466 }
  0x8e   : > { %v474_v45 = vpop.permute.xlu2 %473 }
  0x9c   : > { %v434_v8 = vpop.permute.xlu1 %433 }
  0x9d   : > { %v409_v11 = vpop.permute.xlu0 %408  ;;  %v442_v27 = vmul.f32 %v440_v18, %v434_v8  ;;  %v443_v28 = vmul.f32 %v441_v19, %v434_v8  ;;  %v312_v18 = vand.u32 15, %v1428_v16 }
  0x9e   : > { %v418_v29 = vmul.f32 %v416_v20, %v409_v11  ;;  %v419_v30 = vmul.f32 %v417_v21, %v409_v11  ;;  %v325_v20 = vadd.s32 4294967294, %v305_v17 }
  0x9f   : > { %v326_v21 = vadd.s32 4294967294, %v312_v18 }
  0xa0   : > { %v444_v37 = vadd.f32 %v442_v27, %v418_v29  ;;  %v445_v38 = vadd.f32 %v443_v28, %v419_v30  ;;  %vm327_vm8 = vcmp.ge.s32.totalorder %v325_v20, 0  ;;  %v396_v20 = vadd.s32 32, %v1428_v16 }
  0xa1   : > { %vm328_vm9 = vcmp.ge.s32.totalorder %v326_v21, 0 }
  0xa5   : > { %v448_v31 = vpop.permute.xlu1 %447 }
  0xa6   : > { %v422_v32 = vpop.permute.xlu0 %421  ;;  %v456_v33 = vmul.f32 %v454_v22, %v448_v31  ;;  %v457_v34 = vmul.f32 %v455_v23, %v448_v31 }
  0xa7   : > { %v430_v35 = vmul.f32 %v428_v24, %v422_v32  ;;  %v431_v36 = vmul.f32 %v429_v25, %v422_v32  ;;  %v335_v24 = vadd.s32 4294967295, %v305_v17  ;;  %v336_v25 = vadd.s32 4294967295, %v312_v18 }
  0xa8   : > { %v345_v32 = vadd.s32 1, %v305_v17 }
  0xa9   : > { %v458_v39 = vadd.f32 %v456_v33, %v430_v35  ;;  %v459_v40 = vadd.f32 %v457_v34, %v431_v36  ;;  %vm337_vm11 = vcmp.ge.s32.totalorder %v335_v24, 0  ;;  %vm338_vm12 = vcmp.ge.s32.totalorder %v336_v25, 0 }
  0xaa   : > { %v346_v33 = vadd.s32 1, %v312_v18  ;;  %vm349_vm15 = vcmp.lt.s32.totalorder %v345_v32, 16 }
  0xab   : > { %v460_v41 = vadd.f32 %v458_v39, %v444_v37  ;;  %v461_v42 = vadd.f32 %v459_v40, %v445_v38  ;;  %v355_v39 = vadd.s32 2, %v305_v17  ;;  %v356_v40 = vadd.s32 2, %v312_v18 }
  0xad   : > { %v469_v43 = vmul.f32 %v467_v26, %v460_v41  ;;  %v470_v44 = vmul.f32 %v467_v26, %v461_v42  ;;  %v1245_v26 = vmov -inf  }
  0xae   : > { %v1434_v27 = vsel %vm327_vm8, 0.0, %v1245_v26  ;;  %v1437_v28 = vsel %vm328_vm9, 0.0, %v1245_v26  ;;  %v1445_v34 = vsel %vm337_vm11, 0.0, %v1245_v26  ;;  %v1448_v35 = vsel %vm338_vm12, 0.0, %v1245_v26 }
  0xaf   : > { %v476_v46 = vadd.f32 %v474_v45, %v469_v43  ;;  %v477_v47 = vadd.f32 %v474_v45, %v470_v44  ;;  %vm590_vm9 = vcmp.lt.s32.totalorder %v1425_v15, 112  ;;  %vm400_vm11 = vcmp.lt.s32.totalorder %v396_v20, 256 }
  0xb0   : > { %vm601_vm12 = vcmp.lt.s32.totalorder %v1425_v15, 96 }
  0xb1   : > { %v1033_v48 = vmul.f32 -1.442695, %v476_v46  ;;  %v1034_v49 = vmul.f32 -1.442695, %v477_v47 }
  0xb3   : > { %1123 = vpow2.f32 %v1033_v48  ;;  %v1462_v48 = vsel %vm349_vm15, 0.0, %v1245_v26 }
  0xb4   : > { %1125 = vpow2.f32 %v1034_v49 }
  0xb9   : > { %v1124_v50 = vpop.eup %1123 }
  0xba   : > { %v1126_v51 = vpop.eup %1125  ;;  %v484_v52 = vadd.f32 1.0, %v1124_v50 }
  0xbb   : > { %v485_v53 = vadd.f32 1.0, %v1126_v51 }
  0xbc   : > { %1127 = vrcp.f32 %v484_v52  ;;  %v497_v59 = vand.u32 2147483648, %v484_v52  ;;  %v495_v62 = vand.u32 2147483647, %v484_v52  ;;  %vm491_vm2 = vweird.f32 %v484_v52 }
  0xbd   : > { %1129 = vrcp.f32 %v485_v53  ;;  %v512_v63 = vand.u32 2147483648, %v485_v53  ;;  %v510_v2 = vand.u32 2147483647, %v485_v53  ;;  %vm506_vm4 = vweird.f32 %v485_v53 }
  0xbe   : > { %v498_v4 = vor.u32 1.1754944e-38, %v497_v59  ;;  %vm496_vm5 = vcmp.eq.f32.partialorder %v495_v62, 8.507059e+37 }
  0xbf   : > { %v513_v8 = vor.u32 1.1754944e-38, %v512_v63  ;;  %vm511_vm7 = vcmp.eq.f32.partialorder %v510_v2, 8.507059e+37 }
  0xc2   : > { %v1128_v54 = vpop.eup %1127 }
  0xc3   : > { %v1130_v55 = vpop.eup %1129  ;;  %v487_v56 = vmul.f32 %v1128_v54, %v484_v52  ;;  %vm492_vm0 = vweird.f32 %v1128_v54 }
  0xc4   : > { %v502_v57 = vmul.f32 %v1130_v55, %v485_v53  ;;  %vm507_vm1 = vweird.f32 %v1130_v55  ;;  %vm493_vm3 = vmor %vm491_vm2, %vm492_vm0  ;;  %vm350_vm0 = vcmp.lt.s32.totalorder %v346_v33, 16  ;;  %vm360_vm2 = vcmp.lt.s32.totalorder %v356_v40, 16 }
  0xc5   : > { %v488_v58 = vsub.f32 1.0, %v487_v56  ;;  %vm508_vm6 = vmor %vm506_vm4, %vm507_vm1  ;;  %vm359_vm1 = vcmp.lt.s32.totalorder %v355_v39, 16  ;;  %v1465_v49 = vsel %vm350_vm0, 0.0, %v1245_v26  ;;  %v1527_v39 = vsel %vm400_vm11, 0.0, %v1245_v26 }
  0xc6   : > { %v503_v60 = vsub.f32 1.0, %v502_v57 }
  0xc7   : > { %v489_v61 = vmul.f32 %v1128_v54, %v488_v58 }
  0xc8   : > { %v504_v0 = vmul.f32 %v1130_v55, %v503_v60 }
  0xc9   : > { %v490_v3 = vadd.f32 %v1128_v54, %v489_v61 }
  0xca   : > { %v505_v6 = vadd.f32 %v1130_v55, %v504_v0 }
  0xcb   : > { %v494_v7 = vsel %vm493_vm3, %v1128_v54, %v490_v3  ;;  %vm557_vm3 = vcmp.lt.s32.totalorder %v1425_v15, 126  ;;  %v1473_v54 = vsel %vm359_vm1, 0.0, %v1245_v26 }
  0xcc   : > { %v499_v9 = vsel %vm496_vm5, %v498_v4, %v494_v7  ;;  %v509_v10 = vsel %vm508_vm6, %v1130_v55, %v505_v6  ;;  %v1476_v55 = vsel %vm360_vm2, 0.0, %v1245_v26  ;;  %v365_v6 = vadd.s32 4294967264, %v1425_v15 }
  0xcd   : > { %v514_v11 = vsel %vm511_vm7, %v513_v8, %v509_v10  ;;  %v1403_v12 = vmul.f32 %v499_v9, %v476_v46  ;;  %vm568_vm5 = vcmp.lt.s32.totalorder %v1425_v15, 32  ;;  %v375_v10 = vadd.s32 4294967280, %v1425_v15 }
  0xce   : > { %v1405_v13 = vmul.f32 %v514_v11, %v477_v47  ;;  %vm367_vm4 = vcmp.ge.s32.totalorder %v365_v6, 0  ;;  %vm579_vm7 = vcmp.lt.s32.totalorder %v1425_v15, 16 }
  0xcf   : > { %518 = vst [vmem:[#allocation2] sm:$0x3] %v1403_v12  ;;  %531 = vrot.lane.b32.xlu0 %v1403_v12, %s1241_s16  ;;  %520 = vrot.lane.b32.xlu1 %v1403_v12, %s1242_s17  ;;  %v1498_v11 = vsel %vm367_vm4, 0.0, %v1245_v26  ;;  %vm377_vm6 = vcmp.ge.s32.totalorder %v375_v10, 0  ;;  %vm933_vm4 = vcmask 1043456  }
  0xd0   : > { %519 = vst [vmem:[#allocation2 + $0x8] sm:$0x3] %v1405_v13  ;;  %522 = vrot.lane.b32.xlu2 %v1405_v13, %s1242_s17  ;;  %v1506_v18 = vsel %vm377_vm6, 0.0, %v1245_v26 }
  0xd7   : > { %544 = vrot.lane.b32.xlu0 %v1405_v13, %s1243_s11  ;;  %533 = vrot.lane.b32.xlu1 %v1405_v13, %s1241_s16 }
  0xd8   : > { %542 = vrot.lane.b32.xlu2 %v1403_v12, %s1243_s11 }
  0xdf   : > { %553 = vrot.lane.b32.xlu1 %v1403_v12, %s1244_s18 }
  0xe0   : > { %555 = vrot.lane.b32.xlu2 %v1405_v13, %s1244_s18 }
 0x12a   : > { %v523_v19 = vpop.permute.xlu2 %522 }
 0x132   : > { %v543_v31 = vpop.permute.xlu2 %542 }
 0x13a   : > { %v556_v56 = vpop.permute.xlu2 %555 }
 0x141   : > { %v532_v22 = vpop.permute.xlu0 %531  ;;  %v521_v23 = vpop.permute.xlu1 %520 }
 0x142   : > { %v525_v29 = vsel %vm524_vm10, %v521_v23, %v523_v19  ;;  %v526_v30 = vsel %vm524_vm10, %v523_v19, %v521_v23 }
 0x143   : > { %v527_v36 = vadd.f32 %v526_v30, %v1434_v27  ;;  %v528_v37 = vadd.f32 %v525_v29, %v1437_v28 }
 0x145   : > { %v529_v46 = vmax.f32 %v1403_v12, %v527_v36  ;;  %v530_v47 = vmax.f32 %v1405_v13, %v528_v37  ;;  %v386_v13 = vadd.s32 16, %v1428_v16 }
 0x147   : > { %vm390_vm8 = vcmp.lt.s32.totalorder %v386_v13, 256 }
 0x148   : > { %v1516_v29 = vsel %vm390_vm8, 0.0, %v1245_v26 }
 0x149   : > { %v534_v38 = vpop.permute.xlu1 %533  ;;  %v545_v43 = vpop.permute.xlu0 %544 }
 0x14a   : > { %v536_v41 = vsel %vm535_vm13, %v532_v22, %v534_v38  ;;  %v537_v42 = vsel %vm535_vm13, %v534_v38, %v532_v22  ;;  %v547_v50 = vsel %vm546_vm14, %v543_v31, %v545_v43  ;;  %v548_v51 = vsel %vm546_vm14, %v545_v43, %v543_v31 }
 0x14b   : > { %v538_v44 = vadd.f32 %v537_v42, %v1445_v34  ;;  %v539_v45 = vadd.f32 %v536_v41, %v1448_v35  ;;  %v549_v57 = vadd.f32 %v547_v50, %v1462_v48  ;;  %v550_v58 = vadd.f32 %v548_v51, %v1465_v49 }
 0x14d   : > { %v540_v52 = vmax.f32 %v529_v46, %v538_v44  ;;  %v541_v53 = vmax.f32 %v530_v47, %v539_v45 }
 0x14f   : > { %v551_v62 = vmax.f32 %v540_v52, %v549_v57  ;;  %v552_v63 = vmax.f32 %v541_v53, %v550_v58 }
 0x151   : > { %v554_v59 = vpop.permute.xlu1 %553 }
 0x152   : > { %v558_v60 = vsel %vm557_vm3, %v554_v59, %v556_v56  ;;  %v559_v61 = vsel %vm557_vm3, %v556_v56, %v554_v59 }
 0x153   : > { %v560_v0 = vadd.f32 %v558_v60, %v1473_v54  ;;  %v561_v2 = vadd.f32 %v559_v61, %v1476_v55 }
 0x155   : > { %v562_v3 = vmax.f32 %v551_v62, %v560_v0  ;;  %v563_v4 = vmax.f32 %v552_v63, %v561_v2 }
 0x157   : > { %566 = vrot.lane.b32.xlu1 %v563_v4, %s1246_s19  ;;  %575 = vrot.lane.b32.xlu2 %v562_v3, %s1247_s20 }
 0x158   : > { %564 = vrot.lane.b32.xlu0 %v562_v3, %s1246_s19 }
 0x15f   : > { %586 = vrot.lane.b32.xlu1 %v562_v3, %s1248_s22  ;;  %588 = vrot.lane.b32.xlu2 %v563_v4, %s1248_s22 }
 0x160   : > { %577 = vrot.lane.b32.xlu0 %v563_v4, %s1247_s20 }
 0x167   : > { %599 = vrot.lane.b32.xlu1 %v563_v4, %s1249_s21 }
 0x168   : > { %597 = vrot.lane.b32.xlu0 %v562_v3, %s1249_s21 }
 0x1b1   : > { %v576_v8 = vpop.permute.xlu2 %575 }
 0x1b9   : > { %v589_v23 = vpop.permute.xlu2 %588 }
 0x1c9   : > { %v567_v7 = vpop.permute.xlu1 %566 }
 0x1ca   : > { %v565_v9 = vpop.permute.xlu0 %564 }
 0x1cb   : > { %v570_v12 = vsel %vm568_vm5, %v567_v7, %v565_v9  ;;  %v569_v21 = vsel %vm568_vm5, %v565_v9, %v567_v7 }
 0x1cc   : > { %v571_v14 = vadd.f32 %v570_v12, %v1498_v11  ;;  %v574_v16 = vmax.f32 %v563_v4, %v569_v21 }
 0x1ce   : > { %v573_v24 = vmax.f32 %v562_v3, %v571_v14 }
 0x1d1   : > { %v587_v17 = vpop.permute.xlu1 %586 }
 0x1d2   : > { %v578_v19 = vpop.permute.xlu0 %577  ;;  %v592_v30 = vsel %vm590_vm9, %v589_v23, %v587_v17  ;;  %v591_v37 = vsel %vm590_vm9, %v587_v17, %v589_v23 }
 0x1d3   : > { %v581_v22 = vsel %vm579_vm7, %v578_v19, %v576_v8  ;;  %v580_v31 = vsel %vm579_vm7, %v576_v8, %v578_v19  ;;  %v594_v33 = vadd.f32 %v592_v30, %v1516_v29 }
 0x1d4   : > { %v582_v25 = vadd.f32 %v581_v22, %v1506_v18  ;;  %v585_v36 = vmax.f32 %v574_v16, %v580_v31 }
 0x1d6   : > { %v584_v32 = vmax.f32 %v573_v24, %v582_v25  ;;  %v596_v44 = vmax.f32 %v585_v36, %v594_v33 }
 0x1d8   : > { %v595_v40 = vmax.f32 %v584_v32, %v591_v37 }
 0x1d9   : > { %v600_v38 = vpop.permute.xlu1 %599 }
 0x1da   : > { %v598_v41 = vpop.permute.xlu0 %597 }
 0x1db   : > { %v602_v42 = vsel %vm601_vm12, %v598_v41, %v600_v38  ;;  %v603_v43 = vsel %vm601_vm12, %v600_v38, %v598_v41 }
 0x1dc   : > { %v605_v45 = vadd.f32 %v603_v43, %v1527_v39  ;;  %v606_v46 = vmax.f32 %v595_v40, %v602_v42 }
 0x1de   : > { %v607_v47 = vmax.f32 %v596_v44, %v605_v45  ;;  %v610_v50 = vrot.slane %v606_v46, 6  ;;  %626 = vrot.lane.b32.xlu1 %v606_v46, %s1241_s16 }
 0x1e0   : > { %v611_v51 = vrot.slane %v607_v47, 6  ;;  %614 = vst [vmem:[#allocation2] sm:$0xc] %v610_v50  ;;  %628 = vrot.lane.b32.xlu2 %v607_v47, %s1241_s16  ;;  %618 = vrot.lane.b32.xlu0 %v607_v47, %s1242_s17 }
 0x1e2   : > { %615 = vst [vmem:[#allocation2 + $0x8] sm:$0xc] %v611_v51 }
 0x1e6   : > { %638 = vrot.lane.b32.xlu1 %v607_v47, %s1243_s11 }
 0x1e8   : > { %636 = vrot.lane.b32.xlu0 %v606_v46, %s1243_s11  ;;  %616 = vrot.lane.b32.xlu2 %v606_v46, %s1242_s17 }
 0x1f0   : > { %648 = vrot.lane.b32.xlu0 %v607_v47, %s1244_s18  ;;  %646 = vrot.lane.b32.xlu2 %v606_v46, %s1244_s18 }
 0x23a   : > { %v629_v26 = vpop.permute.xlu2 %628 }
 0x242   : > { %v617_v56 = vpop.permute.xlu2 %616 }
 0x24a   : > { %v647_v12 = vpop.permute.xlu2 %646 }
 0x250   : > { %v627_v52 = vpop.permute.xlu1 %626 }
 0x251   : > { %v630_v63 = vsel %vm535_vm13, %v627_v52, %v629_v26  ;;  %v631_v0 = vsel %vm535_vm13, %v629_v26, %v627_v52 }
 0x252   : > { %v619_v53 = vpop.permute.xlu0 %618  ;;  %v632_v7 = vadd.f32 %v631_v0, %v1445_v34  ;;  %v633_v8 = vadd.f32 %v630_v63, %v1448_v35 }
 0x253   : > { %v620_v57 = vsel %vm524_vm10, %v617_v56, %v619_v53  ;;  %v621_v58 = vsel %vm524_vm10, %v619_v53, %v617_v56 }
 0x254   : > { %v622_v59 = vadd.f32 %v621_v58, %v1434_v27  ;;  %v623_v60 = vadd.f32 %v620_v57, %v1437_v28 }
 0x256   : > { %v624_v4 = vmax.f32 %v606_v46, %v622_v59  ;;  %v625_v6 = vmax.f32 %v607_v47, %v623_v60 }
 0x258   : > { %v639_v62 = vpop.permute.xlu1 %638  ;;  %v634_v13 = vmax.f32 %v624_v4, %v632_v7  ;;  %v635_v14 = vmax.f32 %v625_v6, %v633_v8 }
 0x25a   : > { %v637_v61 = vpop.permute.xlu0 %636 }
 0x25b   : > { %v640_v2 = vsel %vm546_vm14, %v637_v61, %v639_v62  ;;  %v641_v3 = vsel %vm546_vm14, %v639_v62, %v637_v61 }
 0x25c   : > { %v642_v9 = vadd.f32 %v640_v2, %v1462_v48  ;;  %v643_v10 = vadd.f32 %v641_v3, %v1465_v49 }
 0x25e   : > { %v644_v21 = vmax.f32 %v634_v13, %v642_v9  ;;  %v645_v22 = vmax.f32 %v635_v14, %v643_v10 }
 0x262   : > { %v649_v17 = vpop.permute.xlu0 %648 }
 0x263   : > { %v650_v19 = vsel %vm557_vm3, %v647_v12, %v649_v17  ;;  %v651_v20 = vsel %vm557_vm3, %v649_v17, %v647_v12 }
 0x264   : > { %v652_v23 = vadd.f32 %v650_v19, %v1473_v54  ;;  %v653_v24 = vadd.f32 %v651_v20, %v1476_v55 }
 0x266   : > { %v654_v25 = vmax.f32 %v644_v21, %v652_v23  ;;  %v655_v30 = vmax.f32 %v645_v22, %v653_v24 }
 0x268   : > { %658 = vrot.lane.b32.xlu2 %v655_v30, %s1246_s19  ;;  %666 = vrot.lane.b32.xlu0 %v654_v25, %s1247_s20 }
 0x269   : > { %656 = vrot.lane.b32.xlu1 %v654_v25, %s1246_s19 }
 0x270   : > { %676 = vrot.lane.b32.xlu2 %v654_v25, %s1248_s22  ;;  %678 = vrot.lane.b32.xlu0 %v655_v30, %s1248_s22 }
 0x271   : > { %668 = vrot.lane.b32.xlu1 %v655_v30, %s1247_s20 }
 0x278   : > { %688 = vrot.lane.b32.xlu2 %v655_v30, %s1249_s21 }
 0x279   : > { %686 = vrot.lane.b32.xlu1 %v654_v25, %s1249_s21 }
 0x2c2   : > { %v659_v31 = vpop.permute.xlu2 %658 }
 0x2ca   : > { %v677_v36 = vpop.permute.xlu2 %676 }
 0x2d2   : > { %v689_v53 = vpop.permute.xlu2 %688 }
 0x2da   : > { %v667_v16 = vpop.permute.xlu0 %666 }
 0x2db   : > { %v657_v32 = vpop.permute.xlu1 %656 }
 0x2dc   : > { %v661_v33 = vsel %vm568_vm5, %v659_v31, %v657_v32  ;;  %v660_v41 = vsel %vm568_vm5, %v657_v32, %v659_v31 }
 0x2dd   : > { %v662_v37 = vadd.f32 %v661_v33, %v1498_v11  ;;  %v665_v47 = vmax.f32 %v655_v30, %v660_v41 }
 0x2df   : > { %v664_v43 = vmax.f32 %v654_v25, %v662_v37 }
 0x2e2   : > { %v679_v38 = vpop.permute.xlu0 %678 }
 0x2e3   : > { %v669_v40 = vpop.permute.xlu1 %668  ;;  %v681_v45 = vsel %vm590_vm9, %v679_v38, %v677_v36  ;;  %v680_v52 = vsel %vm590_vm9, %v677_v36, %v679_v38 }
 0x2e4   : > { %v671_v42 = vsel %vm579_vm7, %v669_v40, %v667_v16  ;;  %v670_v46 = vsel %vm579_vm7, %v667_v16, %v669_v40  ;;  %v683_v51 = vadd.f32 %v681_v45, %v1516_v29 }
 0x2e5   : > { %v672_v44 = vadd.f32 %v671_v42, %v1506_v18  ;;  %v675_v26 = vmax.f32 %v665_v47, %v670_v46  ;;  %v874_v42 = vld [vmem:[%s1707_s5] sm:$0xf] }
 0x2e7   : > { %v674_v50 = vmax.f32 %v664_v43, %v672_v44  ;;  %v685_v60 = vmax.f32 %v675_v26, %v683_v51  ;;  %v875_v43 = vld [vmem:[%s1708_s6] sm:$0xf] }
 0x2e9   : > { %v684_v56 = vmax.f32 %v674_v50, %v680_v52 }
 0x2eb   : > { %v687_v57 = vpop.permute.xlu1 %686 }
 0x2ec   : > { %v690_v58 = vsel %vm601_vm12, %v687_v57, %v689_v53  ;;  %v691_v59 = vsel %vm601_vm12, %v689_v53, %v687_v57 }
 0x2ed   : > { %v693_v61 = vadd.f32 %v691_v59, %v1527_v39  ;;  %v694_v62 = vmax.f32 %v684_v56, %v690_v58 }
 0x2ef   : > { %v695_v63 = vmax.f32 %v685_v60, %v693_v61  ;;  %v698_v0 = vrot.slane %v694_v62, 4  ;;  %714 = vrot.lane.b32.xlu2 %v694_v62, %s1241_s16 }
 0x2f1   : > { %v699_v2 = vrot.slane %v695_v63, 4  ;;  %702 = vst [vmem:[#allocation2] sm:$0x30] %v698_v0  ;;  %716 = vrot.lane.b32.xlu0 %v695_v63, %s1241_s16  ;;  %706 = vrot.lane.b32.xlu1 %v695_v63, %s1242_s17 }
 0x2f3   : > { %703 = vst [vmem:[#allocation2 + $0x8] sm:$0x30] %v699_v2 }
 0x2f7   : > { %726 = vrot.lane.b32.xlu2 %v695_v63, %s1243_s11 }
 0x2f9   : > { %724 = vrot.lane.b32.xlu1 %v694_v62, %s1243_s11  ;;  %704 = vrot.lane.b32.xlu0 %v694_v62, %s1242_s17  ;;  %s1043_s17 = sshll.u32 %s1315_s28, 3  ;;  %s296_s28 = scalar_lea.vmem [#allocation6], %s1031_s10 }
 0x2fa   : > { %s1189_s10 = scalar_lea.hbm %s1709_s7, 16 }
 0x301   : > { %736 = vrot.lane.b32.xlu1 %v695_v63, %s1244_s18  ;;  %734 = vrot.lane.b32.xlu0 %v694_v62, %s1244_s18 }
 0x349   : > { %v715_v6 = vpop.permute.xlu2 %714 }
 0x351   : > { %v727_v19 = vpop.permute.xlu2 %726 }
 0x363   : > { %v717_v3 = vpop.permute.xlu0 %716  ;;  %v707_v4 = vpop.permute.xlu1 %706 }
 0x364   : > { %v718_v9 = vsel %vm535_vm13, %v715_v6, %v717_v3  ;;  %v719_v10 = vsel %vm535_vm13, %v717_v3, %v715_v6 }
 0x365   : > { %v720_v20 = vadd.f32 %v719_v10, %v1445_v34  ;;  %v721_v21 = vadd.f32 %v718_v9, %v1448_v35 }
 0x36b   : > { %v725_v7 = vpop.permute.xlu1 %724  ;;  %v705_v8 = vpop.permute.xlu0 %704 }
 0x36c   : > { %v708_v12 = vsel %vm524_vm10, %v705_v8, %v707_v4  ;;  %v709_v13 = vsel %vm524_vm10, %v707_v4, %v705_v8  ;;  %v728_v24 = vsel %vm546_vm14, %v725_v7, %v727_v19  ;;  %v729_v25 = vsel %vm546_vm14, %v727_v19, %v725_v7 }
 0x36d   : > { %v710_v14 = vadd.f32 %v709_v13, %v1434_v27  ;;  %v711_v17 = vadd.f32 %v708_v12, %v1437_v28  ;;  %v730_v16 = vadd.f32 %v728_v24, %v1462_v48  ;;  %v731_v27 = vadd.f32 %v729_v25, %v1465_v49  ;;  %v792_v48 = vld [vmem:[%s1706_s4] sm:$0xf] }
 0x36e   : > { %v1250_v49 = vmov 7  }
 0x36f   : > { %v712_v22 = vmax.f32 %v694_v62, %v710_v14  ;;  %v713_v23 = vmax.f32 %v695_v63, %v711_v17 }
 0x371   : > { %v722_v30 = vmax.f32 %v712_v22, %v720_v20  ;;  %v723_v31 = vmax.f32 %v713_v23, %v721_v21 }
 0x373   : > { %v737_v28 = vpop.permute.xlu1 %736  ;;  %v735_v32 = vpop.permute.xlu0 %734  ;;  %v732_v33 = vmax.f32 %v722_v30, %v730_v16  ;;  %v733_v36 = vmax.f32 %v723_v31, %v731_v27 }
 0x374   : > { %v738_v34 = vsel %vm557_vm3, %v735_v32, %v737_v28  ;;  %v739_v35 = vsel %vm557_vm3, %v737_v28, %v735_v32 }
 0x375   : > { %v740_v37 = vadd.f32 %v738_v34, %v1473_v54  ;;  %v741_v38 = vadd.f32 %v739_v35, %v1476_v55  ;;  %v1251_v54 = vmov 5   ;;  %v1252_v55 = vmov 4  }
 0x377   : > { %v742_v40 = vmax.f32 %v732_v33, %v740_v37  ;;  %v743_v41 = vmax.f32 %v733_v36, %v741_v38 }
 0x379   : > { %746 = vrot.lane.b32.xlu0 %v743_v41, %s1246_s19  ;;  %754 = vrot.lane.b32.xlu1 %v742_v40, %s1247_s20 }
 0x37a   : > { %744 = vrot.lane.b32.xlu2 %v742_v40, %s1246_s19  ;;  %s949_s19 = scalar_lea.hbm %s1709_s7, %s1043_s17 }
 0x381   : > { %764 = vrot.lane.b32.xlu0 %v742_v40, %s1248_s22  ;;  %766 = vrot.lane.b32.xlu1 %v743_v41, %s1248_s22  ;;  %s953_s22 = sshll.u32 %s949_s19, 4  ;;  %s954_s22 = int_to_ptr.hbm [resolvable:$true] %s953_s22 }
 0x382   : > { %756 = vrot.lane.b32.xlu2 %v743_v41, %s1247_s20  ;;  %s951_s20 = sshll.u32 %s296_s28, 4  ;;  %s1183_s23 = sshra.s32 %s954_s22, 4  ;;  %s952_s20 = int_to_ptr.vmem [resolvable:$true] %s951_s20  ;;  %s1184_s23 = int_to_ptr.hbm [resolvable:$true] %s1183_s23 }
 0x383   : > { %s1185_s29 = scalar_lea.hbm %s1184_s23, 8  ;;  %p1190_p0 = scmp.lt.s32.totalorder %s1184_s23, %s1709_s7 }
 0x384   : > { %p1186_p6 = scmp.ne.s32.totalorder %s1184_s23, %s1185_s29  ;;  %p1191_p1 = scmp.lt.s32.totalorder %s1189_s10, %s1185_s29 }
 0x386   : > { %p1187_p9 = pnand %p1186_p6, %p1344_p11  ;;  %p1192_p3 = por %p1191_p1, %p1190_p0 }
 0x388   : > { %p1188_p13 = pneg %p1187_p9 }
 0x389   : > { %776 = vrot.lane.b32.xlu0 %v743_v41, %s1249_s21  ;;  %797 = vperm.xlu1 %1112, %v792_v48  }
 0x38a   : > { %774 = vrot.lane.b32.xlu2 %v742_v40, %s1249_s21  ;;  %s938_s21 = scalar_lea.sflag [#allocation5], %s1380_s15  ;;  %p1193_p4 = pnand %p1192_p3, %p1188_p13 }
 0x391   : > { %813 = vperm.xlu0 %1114, %v792_v48   ;;  %1115 = vset.pattern.permute.xlu1 %v1239_v5  ;;  %v1253_v5 = vmov 6  }
 0x392   : > { %843 = vperm.xlu1 %1115, %v792_v48   ;;  %805 = vperm.xlu2 %1113, %v792_v48  }
 0x399   : > { %1119 = vset.pattern.permute.xlu0 %v1250_v49 }
 0x39a   : > { %863 = vperm.xlu0 %1119, %v792_v48   ;;  %1117 = vset.pattern.permute.xlu1 %v1251_v54 }
 0x39b   : > { %853 = vperm.xlu1 %1117, %v792_v48   ;;  %1116 = vset.pattern.permute.xlu2 %v1252_v55 }
 0x39c   : > { %823 = vperm.xlu2 %1116, %v792_v48  }
 0x3a2   : > { %1122 = vset.pattern.permute.xlu0 %v1238_v1 }
 0x3a3   : > { %1120 = vset.pattern.permute.xlu1 %v1238_v1 }
 0x3a4   : > { %878 = vperm.xlu1 %1120, %v874_v42   ;;  %1118 = vset.pattern.permute.xlu2 %v1253_v5 }
 0x3a5   : > { %833 = vperm.xlu2 %1118, %v792_v48  }
 0x3ad   : > { %1121 = vset.pattern.permute.xlu2 %v1238_v1 }
 0x3ae   : > { %885 = vperm.xlu2 %1121, %v875_v43  }
 0x3d4   : > { %v745_v44 = vpop.permute.xlu2 %744 }
 0x3dc   : > { %v757_v45 = vpop.permute.xlu2 %756 }
 0x3e4   : > { %v775_v51 = vpop.permute.xlu2 %774 }
 0x3eb   : > { %v747_v46 = vpop.permute.xlu0 %746  ;;  %v755_v47 = vpop.permute.xlu1 %754 }
 0x3ec   : > { %v749_v50 = vsel %vm568_vm5, %v747_v46, %v745_v44  ;;  %v748_v56 = vsel %vm568_vm5, %v745_v44, %v747_v46  ;;  %v759_v57 = vsel %vm579_vm7, %v757_v45, %v755_v47  ;;  %v806_v63 = vpop.permute.xlu2 %805  ;;  %v758_v0 = vsel %vm579_vm7, %v755_v47, %v757_v45 }
 0x3ed   : > { %v750_v26 = vadd.f32 %v749_v50, %v1498_v11  ;;  %v753_v59 = vmax.f32 %v743_v41, %v748_v56  ;;  %v760_v60 = vadd.f32 %v759_v57, %v1506_v18 }
 0x3ef   : > { %v752_v1 = vmax.f32 %v742_v40, %v750_v26  ;;  %v763_v2 = vmax.f32 %v753_v59, %v758_v0 }
 0x3f1   : > { %v762_v62 = vmax.f32 %v752_v1, %v760_v60 }
 0x3f3   : > { %v765_v52 = vpop.permute.xlu0 %764  ;;  %v767_v53 = vpop.permute.xlu1 %766 }
 0x3f4   : > { %v769_v58 = vsel %vm590_vm9, %v767_v53, %v765_v52  ;;  %v768_v61 = vsel %vm590_vm9, %v765_v52, %v767_v53 }
 0x3f5   : > { %v771_v11 = vadd.f32 %v769_v58, %v1516_v29  ;;  %v772_v3 = vmax.f32 %v762_v62, %v768_v61 }
 0x3f6   : > { %v824_v14 = vpop.permute.xlu2 %823 }
 0x3f7   : > { %v773_v8 = vmax.f32 %v763_v2, %v771_v11 }
 0x3fb   : > { %v777_v4 = vpop.permute.xlu0 %776  ;;  %v798_v6 = vpop.permute.xlu1 %797 }
 0x3fc   : > { %v778_v7 = vsel %vm601_vm12, %v775_v51, %v777_v4  ;;  %v779_v18 = vsel %vm601_vm12, %v777_v4, %v775_v51 }
 0x3fd   : > { %v781_v9 = vadd.f32 %v779_v18, %v1527_v39  ;;  %v782_v10 = vmax.f32 %v772_v3, %v778_v7 }
 0x3ff   : > { %v783_v12 = vmax.f32 %v773_v8, %v781_v9  ;;  %v786_v29 = vrot.slane %v782_v10, 2  ;;  %v834_v38 = vpop.permute.xlu2 %833 }
 0x401   : > { %v787_v13 = vrot.slane %v783_v12, 2  ;;  %790 = vst [vmem:[#allocation2] sm:$0xc0] %v786_v29 }
 0x403   : > { %791 = vst [vmem:[#allocation2 + $0x8] sm:$0xc0] %v787_v13  ;;  %v814_v19 = vpop.permute.xlu0 %813 }
 0x404   : > { %v844_v17 = vpop.permute.xlu1 %843 }
 0x408   : > { %v793_v20 = vld [vmem:[#allocation2] sm:$0xff]  ;;  %v886_v4 = vpop.permute.xlu2 %885 }
 0x409   : > { %v800_v21 = vperm.slane %v793_v20, 0  ;;  %v826_v22 = vperm.slane %v793_v20, 4  ;;  %v816_v23 = vperm.slane %v793_v20, 2  ;;  %v808_v24 = vperm.slane %v793_v20, 1 }
 0x40a   : > { %v794_v25 = vld [vmem:[#allocation2 + $0x8] sm:$0xff]  ;;  %v846_v15 = vperm.slane %v793_v20, 3  ;;  %v836_v39 = vperm.slane %v793_v20, 6  ;;  %v866_v5 = vperm.slane %v793_v20, 7  ;;  %v856_v43 = vperm.slane %v793_v20, 5 }
 0x40b   : > { %v801_v30 = vperm.slane %v794_v25, 0  ;;  %v802_v31 = vmul.f32 %v800_v21, %v798_v6  ;;  %v827_v16 = vperm.slane %v794_v25, 4  ;;  %v817_v27 = vperm.slane %v794_v25, 2 }
 0x40c   : > { %v818_v28 = vmul.f32 %v816_v23, %v814_v19  ;;  %v809_v32 = vperm.slane %v794_v25, 1  ;;  %v810_v34 = vmul.f32 %v808_v24, %v806_v63  ;;  %v828_v33 = vmul.f32 %v826_v22, %v824_v14  ;;  %v864_v50 = vpop.permute.xlu0 %863 }
 0x40d   : > { %v803_v35 = vmul.f32 %v801_v30, %v798_v6  ;;  %v847_v36 = vperm.slane %v794_v25, 3  ;;  %v848_v37 = vmul.f32 %v846_v15, %v844_v17  ;;  %v854_v40 = vpop.permute.xlu1 %853  ;;  %v819_v41 = vmul.f32 %v817_v27, %v814_v19 }
 0x40e   : > { %v820_v48 = vadd.f32 %v818_v28, %v802_v31  ;;  %v811_v49 = vmul.f32 %v809_v32, %v806_v63  ;;  %v837_v54 = vperm.slane %v794_v25, 6  ;;  %v829_v44 = vmul.f32 %v827_v16, %v824_v14 }
 0x40f   : > { %v849_v55 = vmul.f32 %v847_v36, %v844_v17  ;;  %v850_v42 = vadd.f32 %v848_v37, %v810_v34  ;;  %v821_v45 = vadd.f32 %v819_v41, %v803_v35  ;;  %v838_v47 = vmul.f32 %v836_v39, %v834_v38 }
 0x410   : > { %v830_v46 = vadd.f32 %v828_v33, %v820_v48  ;;  %v867_v26 = vperm.slane %v794_v25, 7  ;;  %v857_v52 = vperm.slane %v794_v25, 5  ;;  %v858_v53 = vmul.f32 %v856_v43, %v854_v40 }
 0x411   : > { %v851_v51 = vadd.f32 %v849_v55, %v811_v49  ;;  %v831_v56 = vadd.f32 %v829_v44, %v821_v45  ;;  %v839_v57 = vmul.f32 %v837_v54, %v834_v38  ;;  %v868_v58 = vmul.f32 %v866_v5, %v864_v50 }
 0x412   : > { %v840_v1 = vadd.f32 %v838_v47, %v830_v46  ;;  %v859_v59 = vmul.f32 %v857_v52, %v854_v40  ;;  %v860_v60 = vadd.f32 %v858_v53, %v850_v42  ;;  %v869_v62 = vmul.f32 %v867_v26, %v864_v50 }
 0x413   : > { %v841_v61 = vadd.f32 %v839_v57, %v831_v56 }
 0x414   : > { %v861_v11 = vadd.f32 %v859_v59, %v851_v51  ;;  %v870_v63 = vadd.f32 %v868_v58, %v860_v60 }
 0x416   : > { %v879_v0 = vpop.permute.xlu1 %878  ;;  %v871_v2 = vadd.f32 %v869_v62, %v861_v11  ;;  %v872_v3 = vadd.f32 %v870_v63, %v840_v1 }
 0x418   : > { %v873_v6 = vadd.f32 %v871_v2, %v841_v61  ;;  %v881_v7 = vmul.f32 %v879_v0, %v872_v3 }
 0x41a   : > { %v882_v18 = vmul.f32 %v879_v0, %v873_v6  ;;  %v888_v8 = vadd.f32 %v886_v4, %v881_v7 }
 0x41c   : > { %v889_v9 = vadd.f32 %v886_v4, %v882_v18  ;;  %v1035_v10 = vmul.f32 -1.442695, %v888_v8 }
 0x41e   : > { %1131 = vpow2.f32 %v1035_v10  ;;  %v1036_v12 = vmul.f32 -1.442695, %v889_v9 }
 0x420   : > { %1133 = vpow2.f32 %v1036_v12 }
 0x424   : > { %v1132_v29 = vpop.eup %1131 }
 0x425   : > { %v896_v13 = vadd.f32 1.0, %v1132_v29 }
 0x426   : > { %v1134_v14 = vpop.eup %1133 }
 0x427   : > { %v897_v17 = vadd.f32 1.0, %v1134_v14  ;;  %1135 = vrcp.f32 %v896_v13  ;;  %vm903_vm13 = vweird.f32 %v896_v13  ;;  %v907_v15 = vand.u32 2147483647, %v896_v13 }
 0x428   : > { %v909_v30 = vand.u32 2147483648, %v896_v13 }
 0x429   : > { %1137 = vrcp.f32 %v897_v17  ;;  %v924_v31 = vand.u32 2147483648, %v897_v17  ;;  %v922_v27 = vand.u32 2147483647, %v897_v17  ;;  %vm918_vm0 = vweird.f32 %v897_v17 }
 0x42a   : > { %v910_v34 = vor.u32 1.1754944e-38, %v909_v30  ;;  %vm908_vm2 = vcmp.eq.f32.partialorder %v907_v15, 8.507059e+37 }
 0x42b   : > { %v925_v35 = vor.u32 1.1754944e-38, %v924_v31  ;;  %vm923_vm3 = vcmp.eq.f32.partialorder %v922_v27, 8.507059e+37 }
 0x42d   : > { %v1136_v19 = vpop.eup %1135 }
 0x42e   : > { %v899_v20 = vmul.f32 %v1136_v19, %v896_v13  ;;  %vm904_vm10 = vweird.f32 %v1136_v19 }
 0x42f   : > { %v1138_v21 = vpop.eup %1137  ;;  %vm905_vm15 = vmor %vm903_vm13, %vm904_vm10 }
 0x430   : > { %v900_v22 = vsub.f32 1.0, %v899_v20  ;;  %v914_v23 = vmul.f32 %v1138_v21, %v897_v17  ;;  %vm919_vm14 = vweird.f32 %v1138_v21 }
 0x431   : > { %vm920_vm1 = vmor %vm918_vm0, %vm919_vm14 }
 0x432   : > { %v901_v24 = vmul.f32 %v1136_v19, %v900_v22  ;;  %v915_v25 = vsub.f32 1.0, %v914_v23 }
 0x434   : > { %v902_v16 = vadd.f32 %v1136_v19, %v901_v24  ;;  %v916_v39 = vmul.f32 %v1138_v21, %v915_v25 }
 0x436   : > { %v906_v28 = vsel %vm905_vm15, %v1136_v19, %v902_v16  ;;  %v917_v32 = vadd.f32 %v1138_v21, %v916_v39 }
 0x437   : > { %v911_v36 = vsel %vm908_vm2, %v910_v34, %v906_v28 }
 0x438   : > { %v921_v33 = vsel %vm920_vm1, %v1138_v21, %v917_v32  ;;  %v928_v40 = vmul.f32 %v911_v36, %v888_v8 }
 0x439   : > { %v926_v37 = vsel %vm923_vm3, %v925_v35, %v921_v33 }
 0x43a   : > { %v929_v38 = vmul.f32 %v926_v37, %v889_v9 }
 0x43c   : > { %v932_v41 = vrot.slane %v929_v38, 4 }
 0x43e   : > { %v934_v48 = vsel %vm933_vm4, %v928_v40, %v932_v41 }
 0x43f   : > { %936 = vst [vmem:[%s296_s28] sm:$0xff] %v934_v48 }
 0x440   : > { %1196 = shalt.err (!%p1193_p4)
}
 0x441   : > { %1046 = dma.vmem_to_hbm [thread:$0]  (%p1344_p11), %s952_s20, 128, %s954_s22, %s938_s21  }
 0x442 PF: > { %s965_s15 = sand.u32 1, %s1223_s24   ;;  %p1716_p7 = scmp.ge.s32.totalorder %s1235_s27, 2 }
 0x443   : > { %s966_s17 = scalar_lea.sflag [#allocation5], %s965_s15 }
 0x444   : > { %p1053_p5 = pnand %p1716_p7, %p1348_p12 }
 0x446   : > { %p1054_p8 = pneg %p1053_p5 }
 0x448   : > { %1218 = dma.done.wait (%p1054_p8), %s966_s17, 128  }
 0x449   : > { %1220 = vsyncadd (%p1054_p8), %s966_s17, 4294967168  ;;  %s1717_s11 = sld [smem:[#allocation9_spill]]  ;;  %p20_p10 = scmp.ge.s32.totalorder %s1319_s30, 4  }
 0x44a   : > { %s1718_s24 = smov %s1227_s25  ;;  %s1719_s25 = smov %s1231_s26 }
 0x44b   : > { %s1721_s27 = smov %s1319_s30  ;;  %22 = sbr.rel (!%p20_p10) target bundleno = 5 (0x5), region = 93 }
 0x44f   : > { %s1720_s26 = smov %s1717_s11 }
 0x450   :  { %972 = vsyncpa [#allocation4], 1 }
 0x451   :  { %974 = vsyncpa [#allocation4 + $0x1], 1 }
 0x452   :  { %975 = vsyncpa [#allocation5], 1 }
 0x453   :  { %977 = vsyncpa [#allocation5 + $0x1], 1 }

</bundles_post_ra>
